<compile_context>
chip_gen: v7x
topology: tpu7x:2x2x1
jax: 0.10.0
libtpu: 0.0.40
codegen_flags: <defaults>
</compile_context>

<pallas_src>
import functools

import jax
import jax.numpy as jnp
import numpy as np
from jax.experimental import pallas as pl
from jax.experimental.pallas import tpu as pltpu


def _tlsgcn_kernel(e_ref, xt_ref, xw_ref, pp_ref, t_ref,
                   patches_hbm, poolzt_hbm,
                   out_ref,
                   patches_vmem, poolzt_vmem, dma_sem,
                   *, link_len, dim_in, dim_in_w, dim_out, conv_ch,
                   lane_block, r_fcw, r_fcb, r_bias):
    N, D = e_ref.shape
    K, C, Iw = link_len, dim_in, dim_in_w
    LB = lane_block
    C1 = conv_ch
    Oh = dim_out // 2
    B = xt_ref.shape[1] // LB
    T = xw_ref.shape[0]
    BHW = patches_vmem.shape[1]
    HW = BHW // B

    # Kick off the two largest HBM->VMEM transfers; they overlap with the whole
    # graph branch below and are waited on just before first use.
    cp_patches = pltpu.make_async_copy(patches_hbm, patches_vmem, dma_sem.at[0])
    cp_poolzt = pltpu.make_async_copy(poolzt_hbm, poolzt_vmem, dma_sem.at[1])
    cp_patches.start()
    cp_poolzt.start()

    E = e_ref[...]                                                   # [N, D]

    # ---- supports = softmax(relu(E E^T)); powers k>=1 only ------------------
    # (the identity k=0 support is handled by splicing x_cat directly into ymat)
    A = jax.lax.dot_general(E, E, dimension_numbers=(((1,), (1,)), ((), ())),
                            preferred_element_type=jnp.float32)      # [N, N]
    A = jnp.maximum(A, 0.0)
    A = A - jnp.max(A, axis=1, keepdims=True)
    A = jnp.exp(A)
    A = A / jnp.sum(A, axis=1, keepdims=True)
    powers = [A]
    for _ in range(2, K):
        powers.append(jnp.dot(A, powers[-1], preferred_element_type=jnp.float32))
    s_all = jnp.concatenate(powers, axis=0) if len(powers) > 1 else powers[0]

    # ---- window branch: contract the time axis with T (full-vreg tree-sum) --
    # xt / xw share the same zero-padded [N, B*LB] lane layout (x in lanes [0:C),
    # window input in lanes [C:C+Iw)), so the branch merge is a plain add.
    terms = [t_ref[t] * xw_ref[t] for t in range(T)]                 # [N, B*LB] each
    while len(terms) > 1:
        nxt = [terms[i] + terms[i + 1] for i in range(0, len(terms) - 1, 2)]
        if len(terms) % 2:
            nxt.append(terms[-1])
        terms = nxt
    x_cat = xt_ref[...] + terms[0]                                   # [N, B*LB]

    # ---- ONE fused support matmul over both branches, all batches, all k>=1 -
    y = jnp.dot(s_all, x_cat, preferred_element_type=jnp.float32)    # [(K-1)*N, B*LB]

    # ---- rows=(b,n), cols=(k, LB): every slice/concat is 128-lane aligned ---
    rows = []
    for b in range(B):
        blocks = [x_cat[:, b * LB:(b + 1) * LB]]                     # k = 0 (identity)
        for kk in range(K - 1):
            blocks.append(y[kk * N:(kk + 1) * N, b * LB:(b + 1) * LB])
        rows.append(jnp.concatenate(blocks, axis=1))                 # [N, K*LB]
    ymat = jnp.concatenate(rows, axis=0)                             # [B*N, K*LB]

    # ---- per-node weight contraction as one MXU matmul -----------------------
    # out[b,n,j] = sum_{d,k,c} E[n,d] * ymat[(b,n),(k,c)] * PoolZ[(d,k,c), j]
    # PoolZ is stored transposed ([dim_out, D*K*LB]) for dense HBM rows.
    e_bn = jnp.concatenate([E] * B, axis=0)                          # [B*N, D]
    z = jnp.concatenate([ymat * e_bn[:, d:d + 1] for d in range(D)], axis=1)
    cp_poolzt.wait()
    conv_both = jax.lax.dot_general(
        z, poolzt_vmem[...], dimension_numbers=(((1,), (1,)), ((), ())),
        preferred_element_type=jnp.float32)                          # [B*N, dim_out]

    # ---- CNN surrogate, lane-dense: [C1,9] @ [9,B*H*W] -----------------------
    cp_patches.wait()
    convw = pp_ref[0:C1, 0:9]                                        # [C1, 9]
    convb = pp_ref[0:C1, 9:10]                                       # [C1, 1]
    conv = jnp.dot(convw, patches_vmem[...],
                   preferred_element_type=jnp.float32) + convb
    conv = jnp.maximum(conv, 0.0)                                    # [C1, B*H*W]
    # mean-pool per batch: iota-built [B, B*H*W] mask, lanes-contracting dot
    lane = jax.lax.broadcasted_iota(jnp.int32, (B, BHW), 1)
    brow = jax.lax.broadcasted_iota(jnp.int32, (B, BHW), 0)
    lo = brow * HW
    poolm = jnp.where(jnp.logical_and(lane >= lo, lane < lo + HW),
                      jnp.float32(1.0 / HW), jnp.float32(0.0))
    feat = jax.lax.dot_general(poolm, conv,
                               dimension_numbers=(((1,), (1,)), ((), ())),
                               preferred_element_type=jnp.float32)   # [B, C1]
    fcw = pp_ref[r_fcw:r_fcw + C1, 0:Oh]                             # [C1, Oh]
    fcb = pp_ref[r_fcb:r_fcb + 1, 0:Oh]                              # [1, Oh]
    topo = jnp.dot(feat, fcw, preferred_element_type=jnp.float32) + fcb
    topo2 = jnp.concatenate([topo, topo], axis=1)                    # [B, dim_out]

    # ---- modulate by topo, add per-node bias ---------------------------------
    bpool = pp_ref[r_bias:r_bias + D, 0:dim_out]                     # [D, dim_out]
    bias = jnp.dot(E, bpool, preferred_element_type=jnp.float32)     # [N, dim_out]
    bias_bn = jnp.concatenate([bias] * B, axis=0)                    # [B*N, dim_out]
    topo_bn = jnp.concatenate(
        [jnp.broadcast_to(topo2[b:b + 1, :], (N, dim_out)) for b in range(B)],
        axis=0)                                                      # [B*N, dim_out]
    out_ref[...] = conv_both * topo_bn + bias_bn


def tlsgcn_forward(x, x_window, node_embeddings, zigzag_pi, params,
                   *, link_len, dim_out):
    N, D = node_embeddings.shape
    B, _, C = x.shape
    T = x_window.shape[1]
    Iw = x_window.shape[-1]
    Oh = dim_out // 2
    conv_w, conv_b, fc_w, fc_b = params['cnn']
    C1 = conv_w.shape[0]
    H, W = zigzag_pi.shape[-2], zigzag_pi.shape[-1]
    HW = H * W
    LB = 128 * ((C + Iw + 127) // 128)      # lane block per (batch)/(k) group

    # ---- pure-layout glue (zero-padded, lane-aligned operator assembly) ------
    xt_pad = jnp.zeros((N, B, LB), jnp.float32).at[:, :, :C].set(
        jnp.transpose(x, (1, 0, 2))).reshape(N, B * LB)
    xw_pad = jnp.zeros((T, N, B, LB), jnp.float32).at[:, :, :, C:C + Iw].set(
        jnp.transpose(x_window, (1, 2, 0, 3))).reshape(T, N, B * LB)

    pz = jnp.zeros((D, link_len, LB, dim_out), jnp.float32)
    pz = pz.at[:, :, :C, :Oh].set(params['weights_pool'])
    pz = pz.at[:, :, C:C + Iw, Oh:].set(params['weights_window'])
    poolzt = pz.reshape(D * link_len * LB, dim_out).T                # [dim_out, D*K*LB]

    # lane-dense im2col patches of the SAME-padded persistence image: [9, B*H*W]
    pi_pad = jnp.pad(zigzag_pi[:, 0], ((0, 0), (1, 1), (1, 1)))      # [B, H+2, W+2]
    patches = jnp.stack([pi_pad[:, kh:kh + H, kw:kw + W].reshape(B * HW)
                         for kh in range(3) for kw in range(3)], axis=0)

    # pack all tiny parameters into ONE operand (fewer prologue DMAs)
    r8 = lambda v: ((v + 7) // 8) * 8
    r_fcw = r8(C1)
    r_fcb = r_fcw + r8(C1)
    r_bias = r_fcb + 8
    n_rows = r_bias + r8(D)
    pw = max(10, Oh, dim_out)
    packed = jnp.zeros((n_rows, pw), jnp.float32)
    packed = packed.at[0:C1, 0:9].set(conv_w.reshape(C1, 9))
    packed = packed.at[0:C1, 9].set(conv_b)
    packed = packed.at[r_fcw:r_fcw + C1, 0:Oh].set(fc_w)
    packed = packed.at[r_fcb, 0:Oh].set(fc_b)
    packed = packed.at[r_bias:r_bias + D, 0:dim_out].set(params['bias_pool'])

    kernel = functools.partial(_tlsgcn_kernel, link_len=link_len, dim_in=C,
                               dim_in_w=Iw, dim_out=dim_out, conv_ch=C1,
                               lane_block=LB, r_fcw=r_fcw, r_fcb=r_fcb,
                               r_bias=r_bias)

    vmem = pl.BlockSpec(memory_space=pltpu.MemorySpace.VMEM)
    smem = pl.BlockSpec(memory_space=pltpu.MemorySpace.SMEM)
    hbm = pl.BlockSpec(memory_space=pl.ANY)

    flops = 2 * (N * N * D
                 + max(link_len - 2, 0) * N * N * N
                 + max(link_len - 1, 0) * N * N * B * LB
                 + (B * N) * (D * link_len * LB) * dim_out
                 + C1 * 9 * B * HW + B * (B * HW) * C1 + B * C1 * Oh
                 + N * D * dim_out + T * N * B * LB)
    bytes_accessed = 4 * (node_embeddings.size + xt_pad.size + xw_pad.size
                          + patches.size + poolzt.size + packed.size
                          + T + B * N * dim_out)

    out = pl.pallas_call(
        kernel,
        out_shape=jax.ShapeDtypeStruct((B * N, dim_out), jnp.float32),
        in_specs=[vmem, vmem, vmem, vmem, smem, hbm, hbm],
        out_specs=vmem,
        scratch_shapes=[pltpu.VMEM(patches.shape, jnp.float32),
                        pltpu.VMEM(poolzt.shape, jnp.float32),
                        pltpu.SemaphoreType.DMA((2,))],
        cost_estimate=pl.CostEstimate(flops=flops, transcendentals=N * N,
                                      bytes_accessed=bytes_accessed),
    )(node_embeddings, xt_pad, xw_pad, packed, params['T'], patches, poolzt)
    return out.reshape(B, N, dim_out)


def tlsgcn_reference(x, x_window, node_embeddings, zigzag_pi, params,
                     *, link_len, dim_out):
    """Plain-JAX reference mirroring the torch forward (with the CNN surrogate)."""
    N = node_embeddings.shape[0]
    supports = jax.nn.softmax(
        jnp.maximum(node_embeddings @ node_embeddings.T, 0.0), axis=1)
    support_set = [jnp.eye(N, dtype=jnp.float32), supports]
    for _ in range(2, link_len):
        support_set.append(supports @ support_set[-1])
    S = jnp.stack(support_set, axis=0)

    weights = jnp.einsum('nd,dkio->nkio', node_embeddings, params['weights_pool'])
    bias = node_embeddings @ params['bias_pool']
    x_g = jnp.einsum('knm,bmc->bknc', S, x).transpose(0, 2, 1, 3)
    x_gconv = jnp.einsum('bnki,nkio->bno', x_g, weights)

    weights_window = jnp.einsum('nd,dkio->nkio', node_embeddings,
                                params['weights_window'])
    x_w1 = jnp.einsum('knm,btmi->btkni', S, x_window).transpose(0, 1, 3, 2, 4)
    x_w = jnp.einsum('btnki,nkio->btno', x_w1, weights_window).transpose(0, 2, 3, 1)
    x_wconv = x_w @ params['T']

    conv_w, conv_b, fc_w, fc_b = params['cnn']
    conv = jax.lax.conv_general_dilated(
        zigzag_pi, conv_w[:, None], window_strides=(1, 1), padding='SAME',
        dimension_numbers=('NCHW', 'OIHW', 'NCHW'))
    conv = jnp.maximum(conv + conv_b[None, :, None, None], 0.0)
    feat = conv.mean(axis=(2, 3))
    topo = feat @ fc_w + fc_b

    x_tg = x_gconv * topo[:, None, :]
    x_tw = x_wconv * topo[:, None, :]
    return jnp.concatenate([x_tg, x_tw], axis=-1) + bias[None]


if __name__ == "__main__":
    B, N, dim_in, dim_out, link_len, window_len, embed_dim = 2, 16, 4, 8, 3, 4, 8
    Oh = dim_out // 2
    dim_in_w = 1 if (dim_in - 1) % 16 == 0 else dim_in // 2
    H = W = 16
    conv_ch = 4

    key = jax.random.PRNGKey(0)
    ks = jax.random.split(key, 12)
    x = jax.random.normal(ks[0], (B, N, dim_in), jnp.float32)
    x_window = jax.random.normal(ks[1], (B, window_len, N, dim_in_w), jnp.float32)
    node_embeddings = 0.5 * jax.random.normal(ks[2], (N, embed_dim), jnp.float32)
    zigzag_pi = jax.random.uniform(ks[3], (B, 1, H, W), jnp.float32)

    params = {
        'weights_pool': 0.1 * jax.random.normal(
            ks[4], (embed_dim, link_len, dim_in, Oh), jnp.float32),
        'weights_window': 0.1 * jax.random.normal(
            ks[5], (embed_dim, link_len, dim_in_w, Oh), jnp.float32),
        'bias_pool': 0.1 * jax.random.normal(ks[6], (embed_dim, dim_out), jnp.float32),
        'T': 0.1 * jax.random.normal(ks[7], (window_len,), jnp.float32),
        'cnn': (0.1 * jax.random.normal(ks[8], (conv_ch, 3, 3), jnp.float32),
                0.1 * jax.random.normal(ks[9], (conv_ch,), jnp.float32),
                0.1 * jax.random.normal(ks[10], (conv_ch, Oh), jnp.float32),
                0.1 * jax.random.normal(ks[11], (Oh,), jnp.float32)),
    }

    out = tlsgcn_forward(x, x_window, node_embeddings, zigzag_pi, params,
                         link_len=link_len, dim_out=dim_out)
    out = jax.block_until_ready(out)

    ref = tlsgcn_reference(x, x_window, node_embeddings, zigzag_pi, params,
                           link_len=link_len, dim_out=dim_out)
    np.testing.assert_allclose(np.asarray(out), np.asarray(ref),
                               rtol=1e-4, atol=1e-4)
    print("KERNEL_OK")
</pallas_src>

<mosaic_0001>
module attributes {stable_mosaic.version = 11 : i64} {
  func.func @_tlsgcn_kernel(%arg0: memref<16x8xf32, #tpu.memory_space<vmem>>, %arg1: memref<16x256xf32, #tpu.memory_space<vmem>>, %arg2: memref<4x16x256xf32, #tpu.memory_space<vmem>>, %arg3: memref<32x10xf32, #tpu.memory_space<vmem>>, %arg4: memref<4xf32, #tpu.memory_space<smem>>, %arg5: memref<9x512xf32, #tpu.memory_space<any>>, %arg6: memref<8x3072xf32, #tpu.memory_space<any>>, %arg7: memref<32x8xf32, #tpu.memory_space<vmem>>, %arg8: memref<9x512xf32, #tpu.memory_space<vmem>>, %arg9: memref<8x3072xf32, #tpu.memory_space<vmem>>, %arg10: memref<2x!tpu.dma_semaphore, #tpu.memory_space<semaphore_mem>>) attributes {dimension_semantics = [], scalar_prefetch = 0 : i64, scratch_operands = 3 : i64, tpu.core_type = #tpu.core_type<tc>} {
    %c0_i32 = arith.constant 0 : i32
    %0 = tpu.memref_slice %arg10[%c0_i32] : memref<2x!tpu.dma_semaphore, #tpu.memory_space<semaphore_mem>> -> memref<1x!tpu.dma_semaphore, #tpu.memory_space<semaphore_mem>>
    %1 = tpu.memref_squeeze %0 : memref<1x!tpu.dma_semaphore, #tpu.memory_space<semaphore_mem>> -> memref<!tpu.dma_semaphore, #tpu.memory_space<semaphore_mem>>
    tpu.enqueue_dma source(%arg5 : memref<9x512xf32, #tpu.memory_space<any>>) target(%arg8 : memref<9x512xf32, #tpu.memory_space<vmem>>) target_semaphore(%1 : memref<!tpu.dma_semaphore, #tpu.memory_space<semaphore_mem>>)
    %c1_i32 = arith.constant 1 : i32
    %2 = tpu.memref_slice %arg10[%c1_i32] : memref<2x!tpu.dma_semaphore, #tpu.memory_space<semaphore_mem>> -> memref<1x!tpu.dma_semaphore, #tpu.memory_space<semaphore_mem>>
    %3 = tpu.memref_squeeze %2 : memref<1x!tpu.dma_semaphore, #tpu.memory_space<semaphore_mem>> -> memref<!tpu.dma_semaphore, #tpu.memory_space<semaphore_mem>>
    tpu.enqueue_dma source(%arg6 : memref<8x3072xf32, #tpu.memory_space<any>>) target(%arg9 : memref<8x3072xf32, #tpu.memory_space<vmem>>) target_semaphore(%3 : memref<!tpu.dma_semaphore, #tpu.memory_space<semaphore_mem>>)
    %c0 = arith.constant 0 : index
    %c0_0 = arith.constant 0 : index
    %4 = vector.load %arg0[%c0, %c0_0] : memref<16x8xf32, #tpu.memory_space<vmem>>, vector<16x8xf32>
    %cst = arith.constant dense<0.000000e+00> : vector<16x16xf32>
    %5 = tpu.matmul %4, %4, %cst {dimension_numbers = #tpu.dot_dimension_numbers<[1], [1], [0], [0], [0, 0, 1, 0], [], []>} : vector<16x8xf32>, vector<16x8xf32>, vector<16x16xf32> -> vector<16x16xf32>
    %cst_1 = arith.constant 0.000000e+00 : f32
    %6 = vector.broadcast %cst_1 : f32 to vector<16x16xf32>
    %7 = arith.maximumf %5, %6 : vector<16x16xf32>
    %cst_2 = arith.constant dense<0xFF800000> : vector<16xf32>
    %8 = vector.multi_reduction <maximumf>, %7, %cst_2 [1] : vector<16x16xf32> to vector<16xf32>
    %9 = vector.shape_cast %8 : vector<16xf32> to vector<16x1xf32>
    %10 = vector.broadcast %9 : vector<16x1xf32> to vector<16x16xf32>
    %11 = arith.subf %7, %10 : vector<16x16xf32>
    %12 = math.exp %11 : vector<16x16xf32>
    %cst_3 = arith.constant dense<0.000000e+00> : vector<16xf32>
    %13 = vector.multi_reduction <add>, %12, %cst_3 [1] : vector<16x16xf32> to vector<16xf32>
    %14 = vector.shape_cast %13 : vector<16xf32> to vector<16x1xf32>
    %15 = vector.broadcast %14 : vector<16x1xf32> to vector<16x16xf32>
    %16 = arith.divf %12, %15 : vector<16x16xf32>
    %cst_4 = arith.constant dense<0.000000e+00> : vector<16x16xf32>
    %17 = tpu.matmul %16, %16, %cst_4 {dimension_numbers = #tpu.dot_dimension_numbers<[1], [0], [0], [1], [0, 0, 1, 1], [], []>} : vector<16x16xf32>, vector<16x16xf32>, vector<16x16xf32> -> vector<16x16xf32>
    %18 = tpu.concatenate %16, %17 in 0 : vector<16x16xf32>, vector<16x16xf32> -> vector<32x16xf32>
    %c0_5 = arith.constant 0 : index
    %19 = memref.load %arg4[%c0_5] : memref<4xf32, #tpu.memory_space<smem>>
    %c0_6 = arith.constant 0 : index
    %c0_7 = arith.constant 0 : index
    %c0_8 = arith.constant 0 : index
    %20 = vector.load %arg2[%c0_6, %c0_7, %c0_8] : memref<4x16x256xf32, #tpu.memory_space<vmem>>, vector<1x16x256xf32>
    %21 = vector.shape_cast %20 : vector<1x16x256xf32> to vector<16x256xf32>
    %22 = vector.broadcast %19 : f32 to vector<16x256xf32>
    %23 = arith.mulf %22, %21 : vector<16x256xf32>
    %c1 = arith.constant 1 : index
    %24 = memref.load %arg4[%c1] : memref<4xf32, #tpu.memory_space<smem>>
    %c1_9 = arith.constant 1 : index
    %c0_10 = arith.constant 0 : index
    %c0_11 = arith.constant 0 : index
    %25 = vector.load %arg2[%c1_9, %c0_10, %c0_11] : memref<4x16x256xf32, #tpu.memory_space<vmem>>, vector<1x16x256xf32>
    %26 = vector.shape_cast %25 : vector<1x16x256xf32> to vector<16x256xf32>
    %27 = vector.broadcast %24 : f32 to vector<16x256xf32>
    %28 = arith.mulf %27, %26 : vector<16x256xf32>
    %c2 = arith.constant 2 : index
    %29 = memref.load %arg4[%c2] : memref<4xf32, #tpu.memory_space<smem>>
    %c2_12 = arith.constant 2 : index
    %c0_13 = arith.constant 0 : index
    %c0_14 = arith.constant 0 : index
    %30 = vector.load %arg2[%c2_12, %c0_13, %c0_14] : memref<4x16x256xf32, #tpu.memory_space<vmem>>, vector<1x16x256xf32>
    %31 = vector.shape_cast %30 : vector<1x16x256xf32> to vector<16x256xf32>
    %32 = vector.broadcast %29 : f32 to vector<16x256xf32>
    %33 = arith.mulf %32, %31 : vector<16x256xf32>
    %c3 = arith.constant 3 : index
    %34 = memref.load %arg4[%c3] : memref<4xf32, #tpu.memory_space<smem>>
    %c3_15 = arith.constant 3 : index
    %c0_16 = arith.constant 0 : index
    %c0_17 = arith.constant 0 : index
    %35 = vector.load %arg2[%c3_15, %c0_16, %c0_17] : memref<4x16x256xf32, #tpu.memory_space<vmem>>, vector<1x16x256xf32>
    %36 = vector.shape_cast %35 : vector<1x16x256xf32> to vector<16x256xf32>
    %37 = vector.broadcast %34 : f32 to vector<16x256xf32>
    %38 = arith.mulf %37, %36 : vector<16x256xf32>
    %39 = arith.addf %23, %28 : vector<16x256xf32>
    %40 = arith.addf %33, %38 : vector<16x256xf32>
    %41 = arith.addf %39, %40 : vector<16x256xf32>
    %c0_18 = arith.constant 0 : index
    %c0_19 = arith.constant 0 : index
    %42 = vector.load %arg1[%c0_18, %c0_19] : memref<16x256xf32, #tpu.memory_space<vmem>>, vector<16x256xf32>
    %43 = arith.addf %42, %41 : vector<16x256xf32>
    %cst_20 = arith.constant dense<0.000000e+00> : vector<32x256xf32>
    %44 = tpu.matmul %18, %43, %cst_20 {dimension_numbers = #tpu.dot_dimension_numbers<[1], [0], [0], [1], [0, 0, 1, 1], [], []>} : vector<32x16xf32>, vector<16x256xf32>, vector<32x256xf32> -> vector<32x256xf32>
    %45 = vector.extract_strided_slice %43 {offsets = [0, 0], sizes = [16, 128], strides = [1, 1]} : vector<16x256xf32> to vector<16x128xf32>
    %46 = vector.extract_strided_slice %44 {offsets = [0, 0], sizes = [16, 128], strides = [1, 1]} : vector<32x256xf32> to vector<16x128xf32>
    %47 = vector.extract_strided_slice %44 {offsets = [16, 0], sizes = [16, 128], strides = [1, 1]} : vector<32x256xf32> to vector<16x128xf32>
    %48 = tpu.concatenate %45, %46, %47 in 1 : vector<16x128xf32>, vector<16x128xf32>, vector<16x128xf32> -> vector<16x384xf32>
    %49 = vector.extract_strided_slice %43 {offsets = [0, 128], sizes = [16, 128], strides = [1, 1]} : vector<16x256xf32> to vector<16x128xf32>
    %50 = vector.extract_strided_slice %44 {offsets = [0, 128], sizes = [16, 128], strides = [1, 1]} : vector<32x256xf32> to vector<16x128xf32>
    %51 = vector.extract_strided_slice %44 {offsets = [16, 128], sizes = [16, 128], strides = [1, 1]} : vector<32x256xf32> to vector<16x128xf32>
    %52 = tpu.concatenate %49, %50, %51 in 1 : vector<16x128xf32>, vector<16x128xf32>, vector<16x128xf32> -> vector<16x384xf32>
    %53 = tpu.concatenate %48, %52 in 0 : vector<16x384xf32>, vector<16x384xf32> -> vector<32x384xf32>
    %54 = tpu.concatenate %4, %4 in 0 : vector<16x8xf32>, vector<16x8xf32> -> vector<32x8xf32>
    %55 = vector.extract_strided_slice %54 {offsets = [0, 0], sizes = [32, 1], strides = [1, 1]} : vector<32x8xf32> to vector<32x1xf32>
    %56 = vector.broadcast %55 : vector<32x1xf32> to vector<32x384xf32>
    %57 = arith.mulf %53, %56 : vector<32x384xf32>
    %58 = vector.extract_strided_slice %54 {offsets = [0, 1], sizes = [32, 1], strides = [1, 1]} : vector<32x8xf32> to vector<32x1xf32>
    %59 = vector.broadcast %58 : vector<32x1xf32> to vector<32x384xf32>
    %60 = arith.mulf %53, %59 : vector<32x384xf32>
    %61 = vector.extract_strided_slice %54 {offsets = [0, 2], sizes = [32, 1], strides = [1, 1]} : vector<32x8xf32> to vector<32x1xf32>
    %62 = vector.broadcast %61 : vector<32x1xf32> to vector<32x384xf32>
    %63 = arith.mulf %53, %62 : vector<32x384xf32>
    %64 = vector.extract_strided_slice %54 {offsets = [0, 3], sizes = [32, 1], strides = [1, 1]} : vector<32x8xf32> to vector<32x1xf32>
    %65 = vector.broadcast %64 : vector<32x1xf32> to vector<32x384xf32>
    %66 = arith.mulf %53, %65 : vector<32x384xf32>
    %67 = vector.extract_strided_slice %54 {offsets = [0, 4], sizes = [32, 1], strides = [1, 1]} : vector<32x8xf32> to vector<32x1xf32>
    %68 = vector.broadcast %67 : vector<32x1xf32> to vector<32x384xf32>
    %69 = arith.mulf %53, %68 : vector<32x384xf32>
    %70 = vector.extract_strided_slice %54 {offsets = [0, 5], sizes = [32, 1], strides = [1, 1]} : vector<32x8xf32> to vector<32x1xf32>
    %71 = vector.broadcast %70 : vector<32x1xf32> to vector<32x384xf32>
    %72 = arith.mulf %53, %71 : vector<32x384xf32>
    %73 = vector.extract_strided_slice %54 {offsets = [0, 6], sizes = [32, 1], strides = [1, 1]} : vector<32x8xf32> to vector<32x1xf32>
    %74 = vector.broadcast %73 : vector<32x1xf32> to vector<32x384xf32>
    %75 = arith.mulf %53, %74 : vector<32x384xf32>
    %76 = vector.extract_strided_slice %54 {offsets = [0, 7], sizes = [32, 1], strides = [1, 1]} : vector<32x8xf32> to vector<32x1xf32>
    %77 = vector.broadcast %76 : vector<32x1xf32> to vector<32x384xf32>
    %78 = arith.mulf %53, %77 : vector<32x384xf32>
    %79 = tpu.concatenate %57, %60, %63, %66, %69, %72, %75, %78 in 1 : vector<32x384xf32>, vector<32x384xf32>, vector<32x384xf32>, vector<32x384xf32>, vector<32x384xf32>, vector<32x384xf32>, vector<32x384xf32>, vector<32x384xf32> -> vector<32x3072xf32>
    %c1_i32_21 = arith.constant 1 : i32
    %80 = tpu.memref_slice %arg10[%c1_i32_21] : memref<2x!tpu.dma_semaphore, #tpu.memory_space<semaphore_mem>> -> memref<1x!tpu.dma_semaphore, #tpu.memory_space<semaphore_mem>>
    %81 = tpu.memref_squeeze %80 : memref<1x!tpu.dma_semaphore, #tpu.memory_space<semaphore_mem>> -> memref<!tpu.dma_semaphore, #tpu.memory_space<semaphore_mem>>
    tpu.wait_dma2 semaphore(%81 : memref<!tpu.dma_semaphore, #tpu.memory_space<semaphore_mem>>) src(%arg6 : memref<8x3072xf32, #tpu.memory_space<any>>) dst(%arg9 : memref<8x3072xf32, #tpu.memory_space<vmem>>)
    %c0_22 = arith.constant 0 : index
    %c0_23 = arith.constant 0 : index
    %82 = vector.load %arg9[%c0_22, %c0_23] : memref<8x3072xf32, #tpu.memory_space<vmem>>, vector<8x3072xf32>
    %cst_24 = arith.constant dense<0.000000e+00> : vector<32x8xf32>
    %83 = tpu.matmul %79, %82, %cst_24 {dimension_numbers = #tpu.dot_dimension_numbers<[1], [1], [0], [0], [0, 0, 1, 0], [], []>} : vector<32x3072xf32>, vector<8x3072xf32>, vector<32x8xf32> -> vector<32x8xf32>
    %c0_i32_25 = arith.constant 0 : i32
    %84 = tpu.memref_slice %arg10[%c0_i32_25] : memref<2x!tpu.dma_semaphore, #tpu.memory_space<semaphore_mem>> -> memref<1x!tpu.dma_semaphore, #tpu.memory_space<semaphore_mem>>
    %85 = tpu.memref_squeeze %84 : memref<1x!tpu.dma_semaphore, #tpu.memory_space<semaphore_mem>> -> memref<!tpu.dma_semaphore, #tpu.memory_space<semaphore_mem>>
    tpu.wait_dma2 semaphore(%85 : memref<!tpu.dma_semaphore, #tpu.memory_space<semaphore_mem>>) src(%arg5 : memref<9x512xf32, #tpu.memory_space<any>>) dst(%arg8 : memref<9x512xf32, #tpu.memory_space<vmem>>)
    %c0_26 = arith.constant 0 : index
    %c0_27 = arith.constant 0 : index
    %86 = vector.load %arg3[%c0_26, %c0_27] : memref<32x10xf32, #tpu.memory_space<vmem>>, vector<4x9xf32>
    %c0_28 = arith.constant 0 : index
    %c9 = arith.constant 9 : index
    %87 = vector.load %arg3[%c0_28, %c9] : memref<32x10xf32, #tpu.memory_space<vmem>>, vector<4x1xf32>
    %c0_29 = arith.constant 0 : index
    %c0_30 = arith.constant 0 : index
    %88 = vector.load %arg8[%c0_29, %c0_30] : memref<9x512xf32, #tpu.memory_space<vmem>>, vector<9x512xf32>
    %cst_31 = arith.constant dense<0.000000e+00> : vector<4x512xf32>
    %89 = tpu.matmul %86, %88, %cst_31 {dimension_numbers = #tpu.dot_dimension_numbers<[1], [0], [0], [1], [0, 0, 1, 1], [], []>} : vector<4x9xf32>, vector<9x512xf32>, vector<4x512xf32> -> vector<4x512xf32>
    %90 = vector.broadcast %87 : vector<4x1xf32> to vector<4x512xf32>
    %91 = arith.addf %89, %90 : vector<4x512xf32>
    %cst_32 = arith.constant 0.000000e+00 : f32
    %92 = vector.broadcast %cst_32 : f32 to vector<4x512xf32>
    %93 = arith.maximumf %91, %92 : vector<4x512xf32>
    %94 = tpu.iota {dimensions = array<i32: 1>} : vector<2x512xi32>
    %95 = tpu.iota {dimensions = array<i32: 0>} : vector<2x512xi32>
    %c256_i32 = arith.constant 256 : i32
    %96 = vector.broadcast %c256_i32 : i32 to vector<2x512xi32>
    %97 = arith.muli %95, %96 : vector<2x512xi32>
    %98 = arith.cmpi sge, %94, %97 : vector<2x512xi32>
    %c256_i32_33 = arith.constant 256 : i32
    %99 = vector.broadcast %c256_i32_33 : i32 to vector<2x512xi32>
    %100 = arith.addi %97, %99 : vector<2x512xi32>
    %101 = arith.cmpi slt, %94, %100 : vector<2x512xi32>
    %102 = arith.andi %98, %101 : vector<2x512xi1>
    %cst_34 = arith.constant 3.906250e-03 : f32
    %cst_35 = arith.constant 0.000000e+00 : f32
    %103 = vector.broadcast %cst_34 : f32 to vector<2x512xf32>
    %104 = vector.broadcast %cst_35 : f32 to vector<2x512xf32>
    %105 = arith.select %102, %103, %104 : vector<2x512xi1>, vector<2x512xf32>
    %cst_36 = arith.constant dense<0.000000e+00> : vector<2x4xf32>
    %106 = tpu.matmul %105, %93, %cst_36 {dimension_numbers = #tpu.dot_dimension_numbers<[1], [1], [0], [0], [0, 0, 1, 0], [], []>} : vector<2x512xf32>, vector<4x512xf32>, vector<2x4xf32> -> vector<2x4xf32>
    %c8 = arith.constant 8 : index
    %c0_37 = arith.constant 0 : index
    %107 = vector.load %arg3[%c8, %c0_37] : memref<32x10xf32, #tpu.memory_space<vmem>>, vector<4x4xf32>
    %c16 = arith.constant 16 : index
    %c0_38 = arith.constant 0 : index
    %108 = vector.load %arg3[%c16, %c0_38] : memref<32x10xf32, #tpu.memory_space<vmem>>, vector<1x4xf32>
    %cst_39 = arith.constant dense<0.000000e+00> : vector<2x4xf32>
    %109 = tpu.matmul %106, %107, %cst_39 {dimension_numbers = #tpu.dot_dimension_numbers<[1], [0], [0], [1], [0, 0, 1, 1], [], []>} : vector<2x4xf32>, vector<4x4xf32>, vector<2x4xf32> -> vector<2x4xf32>
    %110 = vector.broadcast %108 : vector<1x4xf32> to vector<2x4xf32>
    %111 = arith.addf %109, %110 : vector<2x4xf32>
    %112 = tpu.concatenate %111, %111 in 1 : vector<2x4xf32>, vector<2x4xf32> -> vector<2x8xf32>
    %c24 = arith.constant 24 : index
    %c0_40 = arith.constant 0 : index
    %113 = vector.load %arg3[%c24, %c0_40] : memref<32x10xf32, #tpu.memory_space<vmem>>, vector<8x8xf32>
    %cst_41 = arith.constant dense<0.000000e+00> : vector<16x8xf32>
    %114 = tpu.matmul %4, %113, %cst_41 {dimension_numbers = #tpu.dot_dimension_numbers<[1], [0], [0], [1], [0, 0, 1, 1], [], []>} : vector<16x8xf32>, vector<8x8xf32>, vector<16x8xf32> -> vector<16x8xf32>
    %115 = tpu.concatenate %114, %114 in 0 : vector<16x8xf32>, vector<16x8xf32> -> vector<32x8xf32>
    %116 = vector.extract_strided_slice %112 {offsets = [0, 0], sizes = [1, 8], strides = [1, 1]} : vector<2x8xf32> to vector<1x8xf32>
    %117 = vector.shape_cast %116 : vector<1x8xf32> to vector<1x8xf32>
    %118 = vector.broadcast %117 : vector<1x8xf32> to vector<16x8xf32>
    %119 = vector.extract_strided_slice %112 {offsets = [1, 0], sizes = [1, 8], strides = [1, 1]} : vector<2x8xf32> to vector<1x8xf32>
    %120 = vector.shape_cast %119 : vector<1x8xf32> to vector<1x8xf32>
    %121 = vector.broadcast %120 : vector<1x8xf32> to vector<16x8xf32>
    %122 = tpu.concatenate %118, %121 in 0 : vector<16x8xf32>, vector<16x8xf32> -> vector<32x8xf32>
    %123 = arith.mulf %83, %122 : vector<32x8xf32>
    %124 = arith.addf %123, %115 : vector<32x8xf32>
    %c0_42 = arith.constant 0 : index
    %c0_43 = arith.constant 0 : index
    %125 = vector.load %arg7[%c0_42, %c0_43] : memref<32x8xf32, #tpu.memory_space<vmem>>, vector<32x8xf32>
    tpu.vector_store %arg7[%c0_42, %c0_43], %124 {strides = array<i32>} : memref<32x8xf32, #tpu.memory_space<vmem>>, vector<32x8xf32>,
    return
  }
}

</mosaic_0001>

<bundles_post_ra>
// kernel: tpu_custom_call.1
= control target key start
LH: loop header
LB: loop body
LE: loop exit
PB: predicated region body
PF: predicated region fallthrough
CT: control target
= control target key end

     0   :  { %12 = vsyncpa [#allocation6], 0  ;;  %s3243_s0 = inlined_call_operand.vmem [shape: f32[16,8], index: 0, kind: input, shape index: {}]   ;;  %s3244_s1 = inlined_call_operand.hbm [shape: f32[16,256], index: 1, kind: input, shape index: {}]   ;;  %s3245_s2 = inlined_call_operand.hbm [shape: f32[4,16,256], index: 2, kind: input, shape index: {}]   ;;  %s3246_s3 = inlined_call_operand.vmem [shape: f32[32,10], index: 3, kind: input, shape index: {}]   ;;  %s3247_s4 = inlined_call_operand.vmem [shape: f32[4], index: 4, kind: input, shape index: {}]   ;;  %s3248_s5 = inlined_call_operand.vmem [shape: f32[9,512], index: 5, kind: input, shape index: {}]   ;;  %s3249_s6 = inlined_call_operand.hbm [shape: f32[8,3072], index: 6, kind: input, shape index: {}]   ;;  %s3250_s7 = inlined_call_operand.vmem [shape: f32[32,8], index: 7, kind: output, shape index: {}]  }
   0x1   :  { %13 = vsyncpa [#allocation9], 0 }
   0x2   :  { %14 = vsyncpa [#allocation7], 0  ;;  %s2553_s24 = smov [#allocation5]   ;;  %s2465_s28 = scalar_lea.hbm %s3244_s1, 512 }
   0x3   :  { %s22_s25 = sshll.u32 %s2553_s24, 4  ;;  %p2466_p0 = scmp.ne.s32.totalorder %s3244_s1, %s2465_s28  ;;  %s23_s25 = int_to_ptr.vmem [resolvable:$true] %s22_s25 }
   0x4   :  { %p2469_p1 = scmp.lt.u32.totalorder %s2465_s28, %s3244_s1 }
   0x6   :  { %p2471_p2 = pnand %p2469_p1, %p2466_p0 }
   0x8   :  { %2474 = shalt.err (!%p2471_p2)
}
   0x9   :  { %s2475_s10 = scalar_lea.vmem %s23_s25, 512  ;;  %p2480_p4 = scmp.lt.s32.totalorder %s23_s25, %s23_s25 }
   0xa   :  { %p2476_p3 = scmp.ne.s32.totalorder %s23_s25, %s2475_s10  ;;  %p2481_p5 = scmp.lt.s32.totalorder %s2475_s10, %s2475_s10 }
   0xc   :  { %p2482_p6 = por %p2481_p5, %p2480_p4 }
   0xe   :  { %p2483_p7 = pnand %p2482_p6, %p2476_p3 }
  0x10   :  { %2486 = shalt.err (!%p2483_p7)
}
  0x11   :  { %s2554_s11 = smov 256   ;;  %s2555_s12 = smov 16  }
  0x12   :  { %28 = dma.hbm_to_vmem [thread:$0]  %s3244_s1, 512, %s23_s25, [#allocation6], %s2554_s11, %s2554_s11, %s2555_s12  }
  0x13   :  { %s2556_s15 = smov [#allocation8]   ;;  %s49_s19 = sshll.u32 %s3247_s4, 4  ;;  %s50_s19 = int_to_ptr.vmem [resolvable:$true] %s49_s19 }
  0x14   :  { %s34_s16 = sshll.u32 %s2556_s15, 4  ;;  %s2487_s22 = scalar_lea.hbm %s3245_s2, 2048  ;;  %s35_s16 = int_to_ptr.vmem [resolvable:$true] %s34_s16 }
  0x15   :  { %p2488_p8 = scmp.ne.s32.totalorder %s3245_s2, %s2487_s22  ;;  %p2491_p9 = scmp.lt.u32.totalorder %s2487_s22, %s3245_s2 }
  0x17   :  { %p2493_p10 = pnand %p2491_p9, %p2488_p8 }
  0x19   :  { %2496 = shalt.err (!%p2493_p10)
}
  0x1a   :  { %s2497_s1 = scalar_lea.vmem %s35_s16, 2048  ;;  %p2502_p12 = scmp.lt.s32.totalorder %s35_s16, %s35_s16 }
  0x1b   :  { %p2498_p11 = scmp.ne.s32.totalorder %s35_s16, %s2497_s1  ;;  %p2503_p13 = scmp.lt.s32.totalorder %s2497_s1, %s2497_s1 }
  0x1d   :  { %p2504_p0 = por %p2503_p13, %p2502_p12 }
  0x1f   :  { %p2505_p1 = pnand %p2504_p0, %p2498_p11 }
  0x21   :  { %2508 = shalt.err (!%p2505_p1)
}
  0x22   :  { %40 = dma.hbm_to_vmem [thread:$0]  %s3245_s2, 2048, %s35_s16, [#allocation9], %s2554_s11, %s2554_s11, %s2555_s12  }
  0x23   :  { %s2509_s28 = scalar_lea.vmem %s50_s19, 16  ;;  %p2514_p3 = scmp.lt.s32.totalorder %s50_s19, %s50_s19 }
  0x24   :  { %p2510_p2 = scmp.ne.s32.totalorder %s50_s19, %s2509_s28  ;;  %p2515_p4 = scmp.lt.s32.totalorder %s2509_s28, %s2509_s28 }
  0x26   :  { %p2516_p5 = por %p2515_p4, %p2514_p3 }
  0x28   :  { %p2517_p6 = pnand %p2516_p5, %p2510_p2 }
  0x2a   :  { %2520 = shalt.err (!%p2517_p6)
}
  0x2b   :  { %s2557_s29 = smov [#allocation10]  }
  0x2c   :  { %52 = dma.vmem_to_smem %s50_s19, 16, %s2557_s29, [#allocation7]  }
  0x2d   :  { %2543 = dma.done.wait [#allocation6], 512  }
  0x2e   :  { %2544 = vsyncadd [#allocation6], 4294966784 }
  0x2f   :  { %2545 = dma.done.wait [#allocation9], 2048  }
  0x30   :  { %2546 = vsyncadd [#allocation9], 4294965248 }
  0x31   :  { %2547 = dma.done.wait [#allocation7], 16  }
  0x32   :  { %2548 = vsyncadd [#allocation7], 4294967280 }
  0x33   :  { %62 = sfence }
  0x34   :  { %v95_v0 = vld [vmem:[%s3248_s5] sm:$0xff]  ;;  %v97_v1 = vld [vmem:[%s3248_s5 + $0x8] sm:$0xff]  ;;  %v99_v2 = vld [vmem:[%s3248_s5 + $0x10] sm:$0xff]  ;;  %vm133_vm0 = vcmask 64512  }
  0x35   :  { %96 = vst [vmem:[#allocation2] sm:$0xff] %v95_v0  ;;  %98 = vst [vmem:[#allocation2 + $0x8] sm:$0xff] %v97_v1  ;;  %v101_v3 = vld [vmem:[%s3248_s5 + $0x18] sm:$0xff]  ;;  %v103_v4 = vld [vmem:[%s3248_s5 + $0x20] sm:$0xff] }
  0x36   :  { %100 = vst [vmem:[#allocation2 + $0x10] sm:$0xff] %v99_v2  ;;  %v105_v5 = vld [vmem:[%s3248_s5 + $0x28] sm:$0xff]  ;;  %102 = vst [vmem:[#allocation2 + $0x18] sm:$0xff] %v101_v3  ;;  %v107_v6 = vld [vmem:[%s3248_s5 + $0x30] sm:$0xff] }
  0x37   :  { %104 = vst [vmem:[#allocation2 + $0x20] sm:$0xff] %v103_v4  ;;  %106 = vst [vmem:[#allocation2 + $0x28] sm:$0xff] %v105_v5  ;;  %v109_v7 = vld [vmem:[%s3248_s5 + $0x38] sm:$0xff]  ;;  %v2667_v8 = vld [vmem:[%s3243_s0] sm:$0xff] }
  0x38   :  { %108 = vst [vmem:[#allocation2 + $0x30] sm:$0xff] %v107_v6  ;;  %110 = vst [vmem:[#allocation2 + $0x38] sm:$0xff] %v109_v7  ;;  %v2672_v9 = vld [vmem:[%s3243_s0 + $0x8] sm:$0xff] }
  0x39   :  { %3255 = vst [vmem:[#allocation21_spill] sm:$0xff] %v2667_v8  ;;  %3256 = vst [vmem:[#allocation22_spill] sm:$0xff] %v2672_v9 }
  0x3a   :  { %118 = vsyncadd [#allocation4], 1024  ;;  %v2312_v10 = vpack.c.bf16 %v2672_v9, %v2667_v8  ;;  %2292 = vmatprep.mubr.msk.f32.mxu0 %vm133_vm0, %v2667_v8  ;;  %vm217_vm2 = vcmask 130048   ;;  %v2558_v27 = vmov 0   ;;  %v2559_v28 = vmov 1   ;;  %s321_s0 = sld [smem:[#allocation10]] }
  0x3b   :  { %vm2313_vm1 = vmpackc.low %vm133_vm0, %vm133_vm0  ;;  %2445 = vset.pattern.permute.xlu1 %v2558_v27  ;;  %2444 = vset.pattern.permute.xlu0 %v2558_v27  ;;  %v2560_v29 = vmov 4   ;;  %v2561_v30 = vmov 6   ;;  %v2562_v31 = vmov 2   ;;  %v2563_v32 = vmov 7   ;;  %s2251_s5 = sld [smem:[#allocation10 + $0x1]]  ;;  %s2252_s27 = sld [smem:[#allocation10 + $0x2]] }
  0x3c   :  { %2314 = vmatprep.subr.msk.bf16.mxu0 %vm2313_vm1, %v2312_v10  ;;  %v2564_v33 = vmov 3   ;;  %v2565_v34 = vmov 5   ;;  %s2253_s1 = sld [smem:[#allocation10 + $0x3]]  ;;  %v323_v35 = vld [vmem:[#allocation8 + $0x8] sm:$0xff]  ;;  %v325_v36 = vld [vmem:[#allocation8 + $0x18] sm:$0xff]  ;;  %v322_v49 = vld [vmem:[#allocation8] sm:$0xff] }
  0x3d   :  { %2317 = vmatpush3.bf16.xpose.msk.msra.mxu0 %vm2313_vm1, %v2312_v10  ;;  %v334_v38 = vld [vmem:[#allocation8 + $0x28] sm:$0xff]  ;;  %v336_v39 = vld [vmem:[#allocation8 + $0x38] sm:$0xff]  ;;  %v324_v50 = vld [vmem:[#allocation8 + $0x10] sm:$0xff]  ;;  %s2567_s4 = smov [#allocation3]   ;;  %s2521_s30 = scalar_lea.hbm %s3249_s6, 3072 }
  0x3e   :  { %v345_v41 = vld [vmem:[#allocation8 + $0x48] sm:$0xff]  ;;  %v347_v42 = vld [vmem:[#allocation8 + $0x58] sm:$0xff]  ;;  %v333_v54 = vld [vmem:[#allocation8 + $0x20] sm:$0xff]  ;;  %s127_s25 = sshll.u32 %s2567_s4, 4  ;;  %p2522_p7 = scmp.ne.s32.totalorder %s3249_s6, %s2521_s30  ;;  %s128_s25 = int_to_ptr.vmem [resolvable:$true] %s127_s25 }
  0x3f   :  { %v356_v44 = vld [vmem:[#allocation8 + $0x68] sm:$0xff]  ;;  %v358_v45 = vld [vmem:[#allocation8 + $0x78] sm:$0xff]  ;;  %v335_v55 = vld [vmem:[#allocation8 + $0x30] sm:$0xff]  ;;  %p2525_p8 = scmp.lt.u32.totalorder %s2521_s30, %s3249_s6 }
  0x40   :  { %v326_v37 = vstv %s321_s0  ;;  %v344_v56 = vld [vmem:[#allocation8 + $0x40] sm:$0xff]  ;;  %v346_v61 = vld [vmem:[#allocation8 + $0x50] sm:$0xff] }
  0x41   :  { %v337_v40 = vstv %s2251_s5  ;;  %v348_v43 = vstv %s2252_s27  ;;  %v328_v48 = vmul.f32 %v326_v37, %v323_v35  ;;  %v330_v51 = vmul.f32 %v326_v37, %v325_v36  ;;  %v355_v62 = vld [vmem:[#allocation8 + $0x60] sm:$0xff]  ;;  %v357_v63 = vld [vmem:[#allocation8 + $0x70] sm:$0xff]  ;;  %p2527_p9 = pnand %p2525_p8, %p2522_p7 }
  0x42   :  { %v359_v46 = vstv %s2253_s1  ;;  %v339_v52 = vmul.f32 %v337_v40, %v334_v38  ;;  %v341_v53 = vmul.f32 %v337_v40, %v336_v39  ;;  %v350_v57 = vmul.f32 %v348_v43, %v345_v41 }
  0x43   :  { %v352_v58 = vmul.f32 %v348_v43, %v347_v42  ;;  %v361_v59 = vmul.f32 %v359_v46, %v356_v44  ;;  %v363_v60 = vmul.f32 %v359_v46, %v358_v45  ;;  %v327_v0 = vmul.f32 %v326_v37, %v322_v49 }
  0x44   :  { %2293 = vmatmul.mubr.msk.f32.vlgmr.msra.gmra.mrb[0].mxu0 %vm133_vm0, %v2672_v9  ;;  %v329_v2 = vmul.f32 %v326_v37, %v324_v50  ;;  %v338_v3 = vmul.f32 %v337_v40, %v333_v54  ;;  %v340_v4 = vmul.f32 %v337_v40, %v335_v55  ;;  %v349_v5 = vmul.f32 %v348_v43, %v344_v56 }
  0x45   :  { %v351_v6 = vmul.f32 %v348_v43, %v346_v61  ;;  %v360_v7 = vmul.f32 %v359_v46, %v355_v62  ;;  %v362_v10 = vmul.f32 %v359_v46, %v357_v63  ;;  %v3251_v39 = vmov 0.0  }
 0x117   :  { %v2294_v11 = vpop.f32.mrb[0].mxu0 }
 0x118   :  { %v206_v12 = vpop.f32.mrb[1].mxu0  ;;  %v216_v14 = vmax.f32 %v2294_v11, 0.0  ;;  %v365_v11 = vadd.f32 %v339_v52, %v328_v48 }
 0x119   :  { %v215_v13 = vmax.f32 %v206_v12, 0.0  ;;  %v367_v12 = vadd.f32 %v341_v53, %v330_v51 }
 0x11a   :  { %v221_v16 = vsel %vm217_vm2, %v216_v14, -inf }
 0x11b   :  { %v218_v15 = vsel %vm217_vm2, %v215_v13, -inf }
 0x11c   :  { %219 = vmax.xlane.f32.xlu0 %v218_v15  ;;  %v364_v15 = vadd.f32 %v338_v3, %v327_v0 }
 0x120   :  { %222 = vmax.xlane.f32.xlu0 %v221_v16  ;;  %v366_v16 = vadd.f32 %v340_v4, %v329_v2 }
 0x136   :  { %480 = vperm.xlu0 %2444, %v2667_v8  }
 0x13a   :  { %2450 = vset.pattern.permute.xlu0 %v2560_v29 }
 0x13b   :  { %564 = vperm.xlu0 %2450, %v2672_v9  }
 0x13f   :  { %2452 = vset.pattern.permute.xlu0 %v2561_v30 }
 0x140   :  { %600 = vperm.xlu0 %2452, %v2667_v8  }
 0x144   :  { %2455 = vset.pattern.permute.xlu0 %v2563_v32 }
 0x145   :  { %624 = vperm.xlu0 %2455, %v2672_v9  }
 0x1a9   :  { %v220_v17 = vpop.xlane.xlu0 %219 }
 0x1aa   :  { %v224_v18 = vsub.f32 %v215_v13, %v220_v17  ;;  %v369_v13 = vadd.f32 %v361_v59, %v350_v57  ;;  %v368_v17 = vadd.f32 %v360_v7, %v349_v5 }
 0x1ac   :  { %v226_v19 = vmul.f32 1.442695, %v224_v18  ;;  %v370_v18 = vadd.f32 %v362_v10, %v351_v6  ;;  %v372_v27 = vadd.f32 %v368_v17, %v364_v15 }
 0x1ad   :  { %v223_v20 = vpop.xlane.xlu0 %222 }
 0x1ae   :  { %2456 = vpow2.f32 %v226_v19  ;;  %v225_v21 = vsub.f32 %v216_v14, %v223_v20  ;;  %v371_v14 = vadd.f32 %v363_v60, %v352_v58  ;;  %v373_v19 = vadd.f32 %v369_v13, %v365_v11 }
 0x1b0   :  { %v228_v22 = vmul.f32 1.442695, %v225_v21  ;;  %v375_v20 = vadd.f32 %v371_v14, %v367_v12 }
 0x1b2   :  { %2458 = vpow2.f32 %v228_v22  ;;  %v377_v22 = vld [vmem:[#allocation5 + $0x8] sm:$0xff] }
 0x1b5   :  { %v2724_v40 = vpop.permute.xlu0 %480 }
 0x1b8   :  { %v2684_v23 = vpop.eup %2456 }
 0x1b9   :  { %v230_v24 = vsel %vm217_vm2, %v2684_v23, 0.0 }
 0x1ba   :  { %231 = vadd.xlane.f32.xlu1 %v230_v24  ;;  %v379_v24 = vld [vmem:[#allocation5 + $0x18] sm:$0xff]  ;;  %v2824_v11 = vpop.permute.xlu0 %564 }
 0x1bc   :  { %v2688_v25 = vpop.eup %2458 }
 0x1bd   :  { %v233_v26 = vsel %vm217_vm2, %v2688_v25, 0.0 }
 0x1be   :  { %234 = vadd.xlane.f32.xlu1 %v233_v26 }
 0x1bf   :  { %v2842_v17 = vpop.permute.xlu0 %600 }
 0x1cf   :  { %484 = vperm.xlu1 %2445, %v2672_v9  }
 0x1d3   :  { %2446 = vset.pattern.permute.xlu1 %v2559_v28  ;;  %v374_v28 = vadd.f32 %v370_v18, %v366_v16 }
 0x1d4   :  { %500 = vperm.xlu1 %2446, %v2667_v8  }
 0x1d8   :  { %504 = vperm.xlu1 %2446, %v2672_v9  }
 0x1dc   :  { %2447 = vset.pattern.permute.xlu1 %v2562_v31  ;;  %v376_v31 = vld [vmem:[#allocation5] sm:$0xff] }
 0x1dd   :  { %520 = vperm.xlu1 %2447, %v2667_v8   ;;  %v380_v35 = vadd.f32 %v376_v31, %v372_v27 }
 0x1df   :  { %v2735_v43 = vmul.f32 %v2724_v40, %v380_v35 }
 0x1e1   :  { %524 = vperm.xlu1 %2447, %v2672_v9  }
 0x1e5   :  { %2448 = vset.pattern.permute.xlu1 %v2564_v33 }
 0x1e6   :  { %540 = vperm.xlu1 %2448, %v2667_v8  }
 0x1ea   :  { %544 = vperm.xlu1 %2448, %v2672_v9  }
 0x1ee   :  { %2449 = vset.pattern.permute.xlu1 %v2560_v29  ;;  %v2710_v29 = vadd.f32 %v377_v22, %v373_v19  ;;  %v2858_v22 = vpop.permute.xlu0 %624 }
 0x1ef   :  { %560 = vperm.xlu1 %2449, %v2667_v8  }
 0x1f0   :  { %v2739_v44 = vmul.f32 %v2724_v40, %v2710_v29 }
 0x1f3   :  { %2451 = vset.pattern.permute.xlu1 %v2565_v34 }
 0x1f4   :  { %580 = vperm.xlu1 %2451, %v2667_v8  }
 0x1f8   :  { %584 = vperm.xlu1 %2451, %v2672_v9  }
 0x1fc   :  { %2453 = vset.pattern.permute.xlu1 %v2561_v30  ;;  %v2712_v30 = vadd.f32 %v379_v24, %v375_v20  ;;  %v2852_v20 = vmul.f32 %v2842_v17, %v380_v35 }
 0x1fd   :  { %604 = vperm.xlu1 %2453, %v2672_v9  }
 0x1fe   :  { %v2322_v38 = vpack.c.bf16 %v2712_v30, %v2710_v29  ;;  %v2838_v15 = vmul.f32 %v2824_v11, %v2712_v30  ;;  %3269 = vst [vmem:[#allocation35_spill] sm:$0xff] %v2852_v20 }
 0x201   :  { %2454 = vset.pattern.permute.xlu1 %v2563_v32  ;;  %v378_v32 = vld [vmem:[#allocation5 + $0x10] sm:$0xff] }
 0x202   :  { %620 = vperm.xlu1 %2454, %v2667_v8   ;;  %v382_v36 = vadd.f32 %v378_v32, %v374_v28 }
 0x204   :  { %v2834_v14 = vmul.f32 %v2824_v11, %v382_v36  ;;  %v2861_v24 = vmul.f32 %v2858_v22, %v382_v36 }
 0x206   :  { %3271 = vst [vmem:[#allocation37_spill] sm:$0xff] %v2861_v24 }
 0x247   :  { %v232_v47 = vpop.xlane.xlu1 %231 }
 0x248   :  { %2460 = vrcp.f32 %v232_v47 }
 0x24b   :  { %v235_v1 = vpop.xlane.xlu1 %234 }
 0x24c   :  { %2462 = vrcp.f32 %v235_v1 }
 0x252   :  { %v2461_v21 = vpop.eup %2460 }
 0x253   :  { %v237_v26 = vmul.f32 %v2461_v21, %v2684_v23  ;;  %v2324_v23 = vpack.c.bf16 %v382_v36, %v380_v35  ;;  %v2856_v21 = vmul.f32 %v2842_v17, %v2710_v29 }
 0x255   :  { %2299 = vmatprep.mubr.msk.f32.mxu1 %vm217_vm2, %v237_v26  ;;  %3270 = vst [vmem:[#allocation36_spill] sm:$0xff] %v2856_v21 }
 0x256   :  { %v2463_v33 = vpop.eup %2462 }
 0x257   :  { %v239_v34 = vmul.f32 %v2463_v33, %v2688_v25  ;;  %v2722_v25 = vpop.permute.xlu1 %484 }
 0x258   :  { %v2728_v41 = vmul.f32 %v2722_v25, %v382_v36  ;;  %v2732_v42 = vmul.f32 %v2722_v25, %v2712_v30 }
 0x259   :  { %v2318_v37 = vpack.c.bf16 %v239_v34, %v237_v26 }
 0x25b   :  { %2319 = vmatprep.subr.bf16.mxu1 %v2318_v37  ;;  %v2741_v45 = vpop.permute.xlu1 %500 }
 0x25c   :  { %2321 = vmatpush3.bf16.msra.mxu1 %v2318_v37  ;;  %v2744_v46 = vmul.f32 %v2741_v45, %v380_v35  ;;  %v2748_v47 = vmul.f32 %v2741_v45, %v2710_v29 }
 0x25d   :  { %2323 = vmatprep.subr.bf16.mxu1 %v2322_v38 }
 0x25f   :  { %2300 = vmatmul.mubr.msk.f32.vlgmr.msra.gmra.mrb[0].mxu1 %vm217_vm2, %v239_v34  ;;  %v2750_v48 = vpop.permute.xlu1 %504 }
 0x260   :  { %2325 = vmatpush1.bf16.msra.mxu1 %v2324_v23  ;;  %454 = vmatprep.mubr.f32.mxu1 %v3251_v39  ;;  %v2753_v49 = vmul.f32 %v2750_v48, %v382_v36  ;;  %v2757_v50 = vmul.f32 %v2750_v48, %v2712_v30 }
 0x263   :  { %2254 = vmatmul.mubr.msk.f32.vlgmr.msra.gmra.mrb[2].mxu1 %vm217_vm2, %v237_v26  ;;  %v2759_v51 = vpop.permute.xlu1 %520  ;;  %v2865_v26 = vmul.f32 %v2858_v22, %v2712_v30 }
 0x264   :  { %460 = vmatprep.mubr.f32.mxu1 %v3251_v39  ;;  %v2762_v52 = vmul.f32 %v2759_v51, %v380_v35  ;;  %v2766_v53 = vmul.f32 %v2759_v51, %v2710_v29 }
 0x265   :  { %3272 = vst [vmem:[#allocation38_spill] sm:$0xff] %v2865_v26 }
 0x266   :  { %3257 = vst [vmem:[#allocation23_spill] sm:$0xff] %v2762_v52  ;;  %3258 = vst [vmem:[#allocation24_spill] sm:$0xff] %v2766_v53 }
 0x267   :  { %2255 = vmatmul.mubr.msk.f32.gmra.mrb[4].mxu1 %vm217_vm2, %v239_v34  ;;  %v2768_v54 = vpop.permute.xlu1 %524 }
 0x268   :  { %466 = vmatprep.mubr.f32.mxu1 %v3251_v39  ;;  %v2771_v55 = vmul.f32 %v2768_v54, %v382_v36  ;;  %v2775_v56 = vmul.f32 %v2768_v54, %v2712_v30 }
 0x26a   :  { %3259 = vst [vmem:[#allocation25_spill] sm:$0xff] %v2771_v55  ;;  %3260 = vst [vmem:[#allocation26_spill] sm:$0xff] %v2775_v56 }
 0x26b   :  { %v2777_v57 = vpop.permute.xlu1 %540 }
 0x26c   :  { %v2780_v58 = vmul.f32 %v2777_v57, %v380_v35  ;;  %v2784_v59 = vmul.f32 %v2777_v57, %v2710_v29 }
 0x26e   :  { %3261 = vst [vmem:[#allocation27_spill] sm:$0xff] %v2780_v58  ;;  %3262 = vst [vmem:[#allocation28_spill] sm:$0xff] %v2784_v59 }
 0x26f   :  { %v2786_v60 = vpop.permute.xlu1 %544 }
 0x270   :  { %v2789_v61 = vmul.f32 %v2786_v60, %v382_v36  ;;  %v2793_v62 = vmul.f32 %v2786_v60, %v2712_v30 }
 0x272   :  { %3263 = vst [vmem:[#allocation29_spill] sm:$0xff] %v2789_v61  ;;  %3264 = vst [vmem:[#allocation30_spill] sm:$0xff] %v2793_v62 }
 0x273   :  { %v2795_v63 = vpop.permute.xlu1 %560 }
 0x274   :  { %v2798_v0 = vmul.f32 %v2795_v63, %v380_v35  ;;  %v2802_v1 = vmul.f32 %v2795_v63, %v2710_v29 }
 0x277   :  { %v2804_v2 = vpop.permute.xlu1 %580 }
 0x278   :  { %v2807_v3 = vmul.f32 %v2804_v2, %v380_v35  ;;  %v2811_v4 = vmul.f32 %v2804_v2, %v2710_v29 }
 0x27b   :  { %v2813_v5 = vpop.permute.xlu1 %584 }
 0x27c   :  { %v2816_v6 = vmul.f32 %v2813_v5, %v382_v36  ;;  %v2820_v7 = vmul.f32 %v2813_v5, %v2712_v30 }
 0x27f   :  { %v2822_v10 = vpop.permute.xlu1 %604 }
 0x280   :  { %v2827_v12 = vmul.f32 %v2822_v10, %v382_v36  ;;  %v2831_v13 = vmul.f32 %v2822_v10, %v2712_v30 }
 0x282   :  { %3265 = vst [vmem:[#allocation31_spill] sm:$0xff] %v2827_v12  ;;  %3266 = vst [vmem:[#allocation32_spill] sm:$0xff] %v2831_v13 }
 0x283   :  { %v2840_v16 = vpop.permute.xlu1 %620 }
 0x284   :  { %v2845_v18 = vmul.f32 %v2840_v16, %v380_v35  ;;  %v2849_v19 = vmul.f32 %v2840_v16, %v2710_v29 }
 0x286   :  { %3267 = vst [vmem:[#allocation33_spill] sm:$0xff] %v2845_v18  ;;  %3268 = vst [vmem:[#allocation34_spill] sm:$0xff] %v2849_v19 }
 0x332   :  { %v2301_v27 = vpop.f32.mrb[0].mxu1 }
 0x333   :  { %v312_v28 = vpop.f32.mrb[1].mxu1 }
 0x334   :  { %2256 = vmatmul.mubr.msk.f32.gmra.mrb[6].mxu1 %vm217_vm2, %v312_v28 }
 0x335   :  { %472 = vmatprep.mubr.f32.mxu1 %v3251_v39 }
 0x336   :  { %v456_v31 = vpop.f32.mrb[2].mxu1 }
 0x337   :  { %v2870_v32 = vmul.f32 %v2724_v40, %v456_v31  ;;  %v2873_v29 = vmul.f32 %v2741_v45, %v456_v31  ;;  %v2876_v33 = vmul.f32 %v2759_v51, %v456_v31  ;;  %v2879_v34 = vmul.f32 %v2777_v57, %v456_v31  ;;  %v458_v30 = vpop.f32.mrb[3].mxu1 }
 0x338   :  { %v2882_v35 = vmul.f32 %v2795_v63, %v456_v31  ;;  %v2885_v36 = vmul.f32 %v2804_v2, %v456_v31  ;;  %v2888_v37 = vmul.f32 %v2840_v16, %v456_v31  ;;  %v2891_v38 = vmul.f32 %v2842_v17, %v456_v31  ;;  %2257 = vmatmul.mubr.msk.f32.gmra.mrb[8].mxu1 %vm217_vm2, %v2301_v27 }
 0x339   :  { %v2895_v23 = vmul.f32 %v2724_v40, %v458_v30  ;;  %v2898_v28 = vmul.f32 %v2741_v45, %v458_v30  ;;  %v2901_v39 = vmul.f32 %v2759_v51, %v458_v30  ;;  %v2904_v9 = vmul.f32 %v2777_v57, %v458_v30 }
 0x33a   :  { %3273 = vst [vmem:[#allocation39_spill] sm:$0xff] %v2885_v36  ;;  %3274 = vst [vmem:[#allocation40_spill] sm:$0xff] %v2888_v37  ;;  %v2907_v8 = vmul.f32 %v2795_v63, %v458_v30  ;;  %v2910_v31 = vmul.f32 %v2804_v2, %v458_v30  ;;  %v2913_v27 = vmul.f32 %v2842_v17, %v458_v30  ;;  %v462_v26 = vpop.f32.mrb[4].mxu1 }
 0x33b   :  { %3275 = vst [vmem:[#allocation41_spill] sm:$0xff] %v2891_v38  ;;  %3276 = vst [vmem:[#allocation42_spill] sm:$0xff] %v2901_v39  ;;  %v2916_v37 = vmul.f32 %v2840_v16, %v458_v30  ;;  %v2919_v19 = vmul.f32 %v2722_v25, %v462_v26  ;;  %v2922_v24 = vmul.f32 %v2750_v48, %v462_v26  ;;  %v464_v62 = vpop.f32.mrb[5].mxu1 }
 0x33c   :  { %3277 = vst [vmem:[#allocation43_spill] sm:$0xff] %v2910_v31  ;;  %3278 = vst [vmem:[#allocation44_spill] sm:$0xff] %v2913_v27  ;;  %v2925_v18 = vmul.f32 %v2768_v54, %v462_v26  ;;  %v2928_v13 = vmul.f32 %v2786_v60, %v462_v26  ;;  %v2931_v21 = vmul.f32 %v2824_v11, %v462_v26 }
 0x33d   :  { %3279 = vst [vmem:[#allocation45_spill] sm:$0xff] %v2916_v37  ;;  %v2934_v30 = vmul.f32 %v2813_v5, %v462_v26  ;;  %v2937_v37 = vmul.f32 %v2822_v10, %v462_v26  ;;  %v2940_v27 = vmul.f32 %v2858_v22, %v462_v26  ;;  %v2943_v59 = vmul.f32 %v2722_v25, %v464_v62 }
 0x33e   :  { %3280 = vst [vmem:[#allocation46_spill] sm:$0xff] %v2925_v18  ;;  %v2946_v12 = vmul.f32 %v2750_v48, %v464_v62  ;;  %v2949_v61 = vmul.f32 %v2768_v54, %v464_v62  ;;  %v2952_v20 = vmul.f32 %v2786_v60, %v464_v62  ;;  %v2955_v38 = vmul.f32 %v2824_v11, %v464_v62 }
 0x33f   :  { %3281 = vst [vmem:[#allocation47_spill] sm:$0xff] %v2934_v30  ;;  %3282 = vst [vmem:[#allocation48_spill] sm:$0xff] %v2937_v37  ;;  %v2958_v37 = vmul.f32 %v2813_v5, %v464_v62  ;;  %v2961_v26 = vmul.f32 %v2822_v10, %v464_v62 }
 0x340   :  { %3283 = vst [vmem:[#allocation49_spill] sm:$0xff] %v2940_v27  ;;  %3284 = vst [vmem:[#allocation50_spill] sm:$0xff] %v2949_v61  ;;  %v2964_v27 = vmul.f32 %v2858_v22, %v464_v62 }
 0x341   :  { %3285 = vst [vmem:[#allocation51_spill] sm:$0xff] %v2958_v37  ;;  %3286 = vst [vmem:[#allocation52_spill] sm:$0xff] %v2961_v26 }
 0x342   :  { %3287 = vst [vmem:[#allocation53_spill] sm:$0xff] %v2964_v27 }
 0x343   :  { %2530 = shalt.err (!%p2527_p9)  }
 0x344   :  { %s2531_s11 = scalar_lea.vmem %s128_s25, 3072  ;;  %p2536_p11 = scmp.lt.s32.totalorder %s128_s25, %s128_s25 }
 0x345   :  { %p2532_p10 = scmp.ne.s32.totalorder %s128_s25, %s2531_s11  ;;  %p2537_p12 = scmp.lt.s32.totalorder %s2531_s11, %s2531_s11 }
 0x347   :  { %p2538_p13 = por %p2537_p12, %p2536_p11 }
 0x349   :  { %p2539_p0 = pnand %p2538_p13, %p2532_p10 }
 0x34b   :  { %2542 = shalt.err (!%p2539_p0)  }
 0x34c   :  { %130 = dma.hbm_to_vmem [thread:$0]  %s3249_s6, 3072, %s128_s25, [#allocation4 + $0x1] }
 0x407   :  { %v468_v62 = vpop.f32.mrb[6].mxu1 }
 0x408   :  { %v2979_v27 = vmul.f32 %v2724_v40, %v468_v62  ;;  %v2982_v26 = vmul.f32 %v2741_v45, %v468_v62  ;;  %v2985_v58 = vmul.f32 %v2759_v51, %v468_v62  ;;  %v549_v37 = vmul.f32 %v2777_v57, %v468_v62  ;;  %v470_v56 = vpop.f32.mrb[7].mxu1 }
 0x409   :  { %v2989_v61 = vmul.f32 %v2795_v63, %v468_v62  ;;  %v2992_v31 = vmul.f32 %v2804_v2, %v468_v62  ;;  %v2995_v53 = vmul.f32 %v2842_v17, %v468_v62  ;;  %v2998_v39 = vmul.f32 %v2840_v16, %v468_v62 }
 0x40a   :  { %3288 = vst [vmem:[#allocation54_spill] sm:$0xff] %v2985_v58  ;;  %v3001_v30 = vmul.f32 %v2724_v40, %v470_v56  ;;  %v3004_v58 = vmul.f32 %v2741_v45, %v470_v56  ;;  %v3007_v55 = vmul.f32 %v2759_v51, %v470_v56  ;;  %v555_v18 = vmul.f32 %v2777_v57, %v470_v56 }
 0x40b   :  { %3289 = vst [vmem:[#allocation55_spill] sm:$0xff] %v2995_v53  ;;  %3290 = vst [vmem:[#allocation56_spill] sm:$0xff] %v2998_v39  ;;  %v3011_v36 = vmul.f32 %v2795_v63, %v470_v56  ;;  %v3014_v52 = vmul.f32 %v2804_v2, %v470_v56  ;;  %v3017_v62 = vmul.f32 %v2842_v17, %v470_v56  ;;  %v474_v39 = vpop.f32.mrb[8].mxu1 }
 0x40c   :  { %3291 = vst [vmem:[#allocation57_spill] sm:$0xff] %v3007_v55  ;;  %v3020_v40 = vmul.f32 %v2840_v16, %v470_v56  ;;  %v3023_v45 = vmul.f32 %v2722_v25, %v474_v39  ;;  %v3026_v51 = vmul.f32 %v2750_v48, %v474_v39  ;;  %v3029_v57 = vmul.f32 %v2768_v54, %v474_v39  ;;  %v476_v2 = vpop.f32.mrb[9].mxu1 }
 0x40d   :  { %3292 = vst [vmem:[#allocation58_spill] sm:$0xff] %v3014_v52  ;;  %3293 = vst [vmem:[#allocation59_spill] sm:$0xff] %v3017_v62  ;;  %v552_v63 = vmul.f32 %v2786_v60, %v474_v39  ;;  %v3033_v53 = vmul.f32 %v2824_v11, %v474_v39  ;;  %v3036_v17 = vmul.f32 %v2813_v5, %v474_v39 }
 0x40e   :  { %3294 = vst [vmem:[#allocation60_spill] sm:$0xff] %v3020_v40  ;;  %3295 = vst [vmem:[#allocation61_spill] sm:$0xff] %v3029_v57  ;;  %v3039_v56 = vmul.f32 %v2822_v10, %v474_v39  ;;  %v3042_v16 = vmul.f32 %v2858_v22, %v474_v39  ;;  %v3045_v40 = vmul.f32 %v2722_v25, %v476_v2 }
 0x40f   :  { %3296 = vst [vmem:[#allocation62_spill] sm:$0xff] %v3036_v17  ;;  %v3048_v62 = vmul.f32 %v2750_v48, %v476_v2  ;;  %v3051_v55 = vmul.f32 %v2768_v54, %v476_v2  ;;  %v558_v57 = vmul.f32 %v2786_v60, %v476_v2  ;;  %v3055_v52 = vmul.f32 %v2824_v11, %v476_v2 }
 0x410   :  { %3297 = vst [vmem:[#allocation63_spill] sm:$0xff] %v3042_v16  ;;  %v3058_v17 = vmul.f32 %v2813_v5, %v476_v2  ;;  %v3061_v39 = vmul.f32 %v2822_v10, %v476_v2  ;;  %v3064_v25 = vmul.f32 %v2858_v22, %v476_v2 }
 0x411   :  { %2549 = dma.done.wait [#allocation4 + $0x1], 3072 }
 0x412   :  { %2550 = vsyncadd [#allocation4 + $0x1], 4294964224  ;;  %731 = vmatprep.mubr.f32.mxu1 %v2870_v32  ;;  %1156 = vmatprep.mubr.f32.mxu0 %v549_v37  ;;  %v644_v48 = vld [vmem:[#allocation3 + $0x8] sm:$0xff]  ;;  %v654_v54 = vld [vmem:[#allocation3 + $0x58] sm:$0xff] }
 0x413   :  { %v643_v60 = vld [vmem:[#allocation3] sm:$0xff]  ;;  %667 = vmatprep.subr.mxu1 %v644_v48  ;;  %1092 = vmatprep.subr.mxu0 %v654_v54  ;;  %v653_v11 = vld [vmem:[#allocation3 + $0x50] sm:$0xff]  ;;  %v656_v16 = vld [vmem:[#allocation3 + $0x68] sm:$0xff] }
 0x414   :  { %668 = vmatpush1.xpose.msra.mxu1 %v643_v60  ;;  %1093 = vmatpush1.xpose.msra.mxu0 %v653_v11  ;;  %v646_v5 = vld [vmem:[#allocation3 + $0x18] sm:$0xff]  ;;  %v655_v10 = vld [vmem:[#allocation3 + $0x60] sm:$0xff]  ;;  %v645_v22 = vld [vmem:[#allocation3 + $0x10] sm:$0xff] }
 0x415   :  { %1177 = vmatprep.subr.mxu0 %v656_v16  ;;  %752 = vmatprep.subr.mxu1 %v646_v5  ;;  %v658_v32 = vld [vmem:[#allocation3 + $0x78] sm:$0xff]  ;;  %v648_v37 = vld [vmem:[#allocation3 + $0x28] sm:$0xff]  ;;  %v3335_v16 = vld [vmem:[#allocation49_spill] sm:$0xff] }
 0x416   :  { %v3333_v2 = vld [vmem:[#allocation40_spill] sm:$0xff]  ;;  %v3337_v54 = vld [vmem:[#allocation45_spill] sm:$0xff] }
 0x417   :  { %732 = vmatmul.mubr.f32.vlgmr.msra.gmra.mrb[10].mxu1 %v2735_v43  ;;  %1157 = vmatmul.mubr.f32.vlgmr.msra.gmra.mrb[2].mxu0 %v2879_v34  ;;  %v647_v43 = vld [vmem:[#allocation3 + $0x20] sm:$0xff]  ;;  %v3336_v48 = vld [vmem:[#allocation60_spill] sm:$0xff] }
 0x418   :  { %1178 = vmatpush1.xpose.msra.mxu0 %v655_v10  ;;  %736 = vmatprep.mubr.f32.mxu1 %v2919_v19  ;;  %v663_v19 = vld [vmem:[#allocation3 + $0xa0] sm:$0xff] }
 0x419   :  { %1161 = vmatprep.mubr.f32.mxu0 %v552_v63  ;;  %753 = vmatpush1.xpose.msra.mxu1 %v645_v22  ;;  %v3317_v34 = vld [vmem:[#allocation61_spill] sm:$0xff]  ;;  %v3331_v63 = vld [vmem:[#allocation38_spill] sm:$0xff] }
 0x41a   :  { %1262 = vmatprep.subr.mxu0 %v658_v32  ;;  %837 = vmatprep.subr.mxu1 %v648_v37 }
 0x41b   :  { %737 = vmatmul.mubr.f32.gmra.mrb[12].mxu1 %v2728_v41  ;;  %1162 = vmatmul.mubr.f32.gmra.mrb[4].mxu0 %v2928_v13  ;;  %v657_v41 = vld [vmem:[#allocation3 + $0x70] sm:$0xff]  ;;  %v650_v13 = vld [vmem:[#allocation3 + $0x38] sm:$0xff] }
 0x41c   :  { %741 = vmatprep.mubr.f32.mxu1 %v2895_v23  ;;  %1166 = vmatprep.mubr.f32.mxu0 %v555_v18  ;;  %v3312_v18 = vld [vmem:[#allocation41_spill] sm:$0xff] }
 0x41d   :  { %v3321_v23 = vld [vmem:[#allocation57_spill] sm:$0xff] }
 0x41f   :  { %742 = vmatmul.mubr.f32.gmra.mrb[14].mxu1 %v2739_v44  ;;  %1167 = vmatmul.mubr.f32.gmra.mrb[6].mxu0 %v2904_v9  ;;  %v660_v44 = vld [vmem:[#allocation3 + $0x88] sm:$0xff]  ;;  %v659_v9 = vld [vmem:[#allocation3 + $0x80] sm:$0xff] }
 0x420   :  { %746 = vmatprep.mubr.f32.mxu1 %v2943_v59  ;;  %1171 = vmatprep.mubr.f32.mxu0 %v558_v57  ;;  %v3300_v59 = vld [vmem:[#allocation46_spill] sm:$0xff]  ;;  %v3330_v57 = vld [vmem:[#allocation59_spill] sm:$0xff] }
 0x423   :  { %747 = vmatmul.mubr.f32.gmra.mrb[16].mxu1 %v2732_v42  ;;  %1172 = vmatmul.mubr.f32.gmra.mrb[8].mxu0 %v2952_v20  ;;  %v649_v42 = vld [vmem:[#allocation3 + $0x30] sm:$0xff]  ;;  %v666_v20 = vld [vmem:[#allocation3 + $0xb8] sm:$0xff] }
 0x424   :  { %816 = vmatprep.mubr.f32.mxu1 %v2744_v46  ;;  %1241 = vmatprep.mubr.f32.mxu0 %v2882_v35  ;;  %v652_v46 = vld [vmem:[#allocation3 + $0x48] sm:$0xff]  ;;  %v3318_v35 = vld [vmem:[#allocation31_spill] sm:$0xff] }
 0x427   :  { %817 = vmatmul.mubr.f32.vlgmr.msra.gmra.mrb[10].mxu1 %v2979_v27  ;;  %1242 = vmatmul.mubr.f32.vlgmr.msra.gmra.mrb[2].mxu0 %v2798_v0  ;;  %v3302_v0 = vld [vmem:[#allocation25_spill] sm:$0xff]  ;;  %v3324_v27 = vld [vmem:[#allocation52_spill] sm:$0xff] }
 0x428   :  { %1263 = vmatpush1.xpose.msra.mxu0 %v657_v41  ;;  %821 = vmatprep.mubr.f32.mxu1 %v2753_v49  ;;  %v651_v49 = vld [vmem:[#allocation3 + $0x40] sm:$0xff] }
 0x429   :  { %1246 = vmatprep.mubr.f32.mxu0 %v2931_v21  ;;  %838 = vmatpush1.xpose.msra.mxu1 %v647_v43  ;;  %v3313_v21 = vld [vmem:[#allocation54_spill] sm:$0xff] }
 0x42a   :  { %1347 = vmatprep.subr.mxu0 %v660_v44  ;;  %922 = vmatprep.subr.mxu1 %v650_v13 }
 0x42b   :  { %822 = vmatmul.mubr.f32.gmra.mrb[12].mxu1 %v3023_v45  ;;  %1247 = vmatmul.mubr.f32.gmra.mrb[4].mxu0 %v2834_v14  ;;  %v3310_v14 = vld [vmem:[#allocation51_spill] sm:$0xff]  ;;  %v3328_v45 = vld [vmem:[#allocation37_spill] sm:$0xff] }
 0x42c   :  { %826 = vmatprep.mubr.f32.mxu1 %v2748_v47  ;;  %1251 = vmatprep.mubr.f32.mxu0 %v2907_v8  ;;  %v662_v8 = vld [vmem:[#allocation3 + $0x98] sm:$0xff]  ;;  %v661_v47 = vld [vmem:[#allocation3 + $0x90] sm:$0xff] }
 0x42f   :  { %827 = vmatmul.mubr.f32.gmra.mrb[14].mxu1 %v3001_v30  ;;  %1252 = vmatmul.mubr.f32.gmra.mrb[6].mxu0 %v2802_v1  ;;  %v3304_v1 = vld [vmem:[#allocation42_spill] sm:$0xff]  ;;  %v3325_v30 = vld [vmem:[#allocation32_spill] sm:$0xff] }
 0x430   :  { %831 = vmatprep.mubr.f32.mxu1 %v2757_v50  ;;  %1256 = vmatprep.mubr.f32.mxu0 %v2955_v38  ;;  %v3298_v50 = vld [vmem:[#allocation23_spill] sm:$0xff]  ;;  %v3320_v38 = vld [vmem:[#allocation44_spill] sm:$0xff] }
 0x433   :  { %832 = vmatmul.mubr.f32.gmra.mrb[16].mxu1 %v3045_v40  ;;  %1257 = vmatmul.mubr.f32.gmra.mrb[8].mxu0 %v2838_v15  ;;  %v3311_v15 = vld [vmem:[#allocation27_spill] sm:$0xff] }
 0x434   :  { %901 = vmatprep.mubr.f32.mxu1 %v2982_v26  ;;  %1326 = vmatprep.mubr.f32.mxu0 %v2807_v3  ;;  %v3305_v3 = vld [vmem:[#allocation58_spill] sm:$0xff]  ;;  %v3326_v26 = vld [vmem:[#allocation33_spill] sm:$0xff]  ;;  %v3327_v40 = vld [vmem:[#allocation55_spill] sm:$0xff] }
 0x437   :  { %902 = vmatmul.mubr.f32.vlgmr.msra.gmra.mrb[10].mxu1 %v2873_v29  ;;  %1327 = vmatmul.mubr.f32.vlgmr.msra.gmra.mrb[2].mxu0 %v2989_v61  ;;  %v3301_v61 = vld [vmem:[#allocation62_spill] sm:$0xff]  ;;  %v3315_v29 = vld [vmem:[#allocation29_spill] sm:$0xff] }
 0x438   :  { %1348 = vmatpush1.xpose.msra.mxu0 %v659_v9  ;;  %906 = vmatprep.mubr.f32.mxu1 %v3026_v51  ;;  %v3329_v51 = vld [vmem:[#allocation34_spill] sm:$0xff] }
 0x439   :  { %1331 = vmatprep.mubr.f32.mxu0 %v2816_v6  ;;  %923 = vmatpush1.xpose.msra.mxu1 %v649_v42  ;;  %v3307_v6 = vld [vmem:[#allocation43_spill] sm:$0xff] }
 0x43a   :  { %1432 = vmatprep.subr.mxu0 %v662_v8  ;;  %1007 = vmatprep.subr.mxu1 %v652_v46 }
 0x43b   :  { %907 = vmatmul.mubr.f32.gmra.mrb[12].mxu1 %v2922_v24  ;;  %1332 = vmatmul.mubr.f32.gmra.mrb[4].mxu0 %v3033_v53  ;;  %v3299_v53 = vld [vmem:[#allocation39_spill] sm:$0xff] }
 0x43c   :  { %911 = vmatprep.mubr.f32.mxu1 %v3004_v58  ;;  %1336 = vmatprep.mubr.f32.mxu0 %v2811_v4  ;;  %v664_v58 = vld [vmem:[#allocation3 + $0xa8] sm:$0xff]  ;;  %v3306_v4 = vld [vmem:[#allocation24_spill] sm:$0xff]  ;;  %v3314_v24 = vld [vmem:[#allocation35_spill] sm:$0xff] }
 0x43f   :  { %912 = vmatmul.mubr.f32.gmra.mrb[14].mxu1 %v2898_v28  ;;  %1337 = vmatmul.mubr.f32.gmra.mrb[6].mxu0 %v3011_v36  ;;  %v3319_v36 = vld [vmem:[#allocation28_spill] sm:$0xff] }
 0x440   :  { %916 = vmatprep.mubr.f32.mxu1 %v3048_v62  ;;  %1341 = vmatprep.mubr.f32.mxu0 %v2820_v7  ;;  %v3308_v7 = vld [vmem:[#allocation50_spill] sm:$0xff]  ;;  %v3322_v28 = vld [vmem:[#allocation36_spill] sm:$0xff]  ;;  %v665_v62 = vld [vmem:[#allocation3 + $0xb0] sm:$0xff] }
 0x443   :  { %917 = vmatmul.mubr.f32.gmra.mrb[16].mxu1 %v2946_v12  ;;  %1342 = vmatmul.mubr.f32.gmra.mrb[8].mxu0 %v3055_v52  ;;  %v3303_v52 = vld [vmem:[#allocation47_spill] sm:$0xff]  ;;  %v3309_v12 = vld [vmem:[#allocation26_spill] sm:$0xff] }
 0x444   :  { %986 = vmatprep.mubr.f32.mxu1 %v2876_v33  ;;  %1411 = vmatprep.mubr.f32.mxu0 %v2992_v31  ;;  %v3316_v33 = vld [vmem:[#allocation48_spill] sm:$0xff]  ;;  %v3323_v31 = vld [vmem:[#allocation30_spill] sm:$0xff] }
 0x447   :  { %987 = vmatmul.mubr.f32.vlgmr.msra.gmra.mrb[10].mxu1 %v3298_v50  ;;  %1412 = vmatmul.mubr.f32.vlgmr.msra.gmra.mrb[2].mxu0 %v3299_v53 }
 0x448   :  { %1433 = vmatpush1.xpose.msra.mxu0 %v661_v47  ;;  %991 = vmatprep.mubr.f32.mxu1 %v3300_v59 }
 0x449   :  { %1416 = vmatprep.mubr.f32.mxu0 %v3301_v61  ;;  %1008 = vmatpush1.xpose.msra.mxu1 %v651_v49 }
 0x44a   :  { %1517 = vmatprep.subr.mxu0 %v664_v58 }
 0x44b   :  { %992 = vmatmul.mubr.f32.gmra.mrb[12].mxu1 %v3302_v0  ;;  %1417 = vmatmul.mubr.f32.gmra.mrb[4].mxu0 %v3303_v52 }
 0x44c   :  { %996 = vmatprep.mubr.f32.mxu1 %v3304_v1  ;;  %1421 = vmatprep.mubr.f32.mxu0 %v3305_v3 }
 0x44f   :  { %997 = vmatmul.mubr.f32.gmra.mrb[14].mxu1 %v3306_v4  ;;  %1422 = vmatmul.mubr.f32.gmra.mrb[6].mxu0 %v3307_v6 }
 0x450   :  { %1001 = vmatprep.mubr.f32.mxu1 %v3308_v7  ;;  %1426 = vmatprep.mubr.f32.mxu0 %v3058_v17  ;;  %v3334_v17 = vld [vmem:[#allocation63_spill] sm:$0xff] }
 0x453   :  { %1002 = vmatmul.mubr.f32.gmra.mrb[16].mxu1 %v3309_v12  ;;  %1427 = vmatmul.mubr.f32.gmra.mrb[8].mxu0 %v3310_v14 }
 0x454   :  { %1071 = vmatprep.mubr.f32.mxu1 %v3311_v15  ;;  %1496 = vmatprep.mubr.f32.mxu0 %v3312_v18 }
 0x457   :  { %1072 = vmatmul.mubr.f32.vlgmr.msra.gmra.mrb[10].mxu1 %v3313_v21  ;;  %1497 = vmatmul.mubr.f32.vlgmr.msra.gmra.mrb[2].mxu0 %v3314_v24 }
 0x458   :  { %1518 = vmatpush1.xpose.msra.mxu0 %v663_v19  ;;  %1076 = vmatprep.mubr.f32.mxu1 %v3315_v29 }
 0x459   :  { %1501 = vmatprep.mubr.f32.mxu0 %v3316_v33  ;;  %1602 = vmatprep.subr.mxu0 %v666_v20 }
 0x45b   :  { %1077 = vmatmul.mubr.f32.gmra.mrb[12].mxu1 %v3317_v34  ;;  %1502 = vmatmul.mubr.f32.gmra.mrb[4].mxu0 %v3318_v35 }
 0x45c   :  { %1081 = vmatprep.mubr.f32.mxu1 %v3319_v36  ;;  %1506 = vmatprep.mubr.f32.mxu0 %v3320_v38 }
 0x45f   :  { %1082 = vmatmul.mubr.f32.gmra.mrb[14].mxu1 %v3321_v23  ;;  %1507 = vmatmul.mubr.f32.gmra.mrb[6].mxu0 %v3322_v28 }
 0x460   :  { %1086 = vmatprep.mubr.f32.mxu1 %v3323_v31  ;;  %1511 = vmatprep.mubr.f32.mxu0 %v3324_v27 }
 0x463   :  { %1087 = vmatmul.mubr.f32.gmra.mrb[16].mxu1 %v3051_v55  ;;  %1512 = vmatmul.mubr.f32.gmra.mrb[8].mxu0 %v3325_v30  ;;  %v3332_v55 = vld [vmem:[#allocation56_spill] sm:$0xff] }
 0x464   :  { %1581 = vmatprep.mubr.f32.mxu0 %v3326_v26 }
 0x467   :  { %1582 = vmatmul.mubr.f32.vlgmr.msra.gmra.mrb[2].mxu0 %v3327_v40 }
 0x468   :  { %1603 = vmatpush1.xpose.msra.mxu0 %v665_v62  ;;  %1586 = vmatprep.mubr.f32.mxu0 %v3328_v45 }
 0x46b   :  { %1587 = vmatmul.mubr.f32.gmra.mrb[4].mxu0 %v3039_v56  ;;  %v3338_v56 = vld [vmem:[#allocation53_spill] sm:$0xff] }
 0x46c   :  { %1591 = vmatprep.mubr.f32.mxu0 %v3329_v51 }
 0x46f   :  { %1592 = vmatmul.mubr.f32.gmra.mrb[6].mxu0 %v3330_v57 }
 0x470   :  { %1596 = vmatprep.mubr.f32.mxu0 %v3331_v63 }
 0x473   :  { %1597 = vmatmul.mubr.f32.gmra.mrb[8].mxu0 %v3061_v39 }
 0x474   :  { %1666 = vmatprep.mubr.f32.mxu0 %v3332_v55 }
 0x477   :  { %1667 = vmatmul.mubr.f32.vlgmr.msra.gmra.mrb[2].mxu0 %v3333_v2 }
 0x478   :  { %1671 = vmatprep.mubr.f32.mxu0 %v3334_v17 }
 0x47b   :  { %1672 = vmatmul.mubr.f32.gmra.mrb[4].mxu0 %v3335_v16 }
 0x47c   :  { %1676 = vmatprep.mubr.f32.mxu0 %v3336_v48 }
 0x47f   :  { %1677 = vmatmul.mubr.f32.gmra.mrb[6].mxu0 %v3337_v54 }
 0x480   :  { %1681 = vmatprep.mubr.f32.mxu0 %v3064_v25 }
 0x483   :  { %1682 = vmatmul.mubr.f32.gmra.mrb[8].mxu0 %v3338_v56 }
 0x52a   :  { %v1073_v60 = vpop.f32.mrb[10].mxu1 }
 0x52b   :  { %v1075_v11 = vpop.f32.mrb[11].mxu1 }
 0x52e   :  { %v1078_v5 = vpop.f32.mrb[12].mxu1 }
 0x52f   :  { %v1080_v39 = vpop.f32.mrb[13].mxu1 }
 0x532   :  { %v1083_v10 = vpop.f32.mrb[14].mxu1 }
 0x533   :  { %v1085_v22 = vpop.f32.mrb[15].mxu1 }
 0x536   :  { %v1088_v32 = vpop.f32.mrb[16].mxu1 }
 0x537   :  { %v1090_v37 = vpop.f32.mrb[17].mxu1 }
 0x54a   :  { %v1668_v41 = vpop.f32.mrb[2].mxu0 }
 0x54b   :  { %v3158_v43 = vadd.f32 %v1668_v41, %v1073_v60  ;;  %v1670_v44 = vpop.f32.mrb[3].mxu0 }
 0x54e   :  { %v1673_v13 = vpop.f32.mrb[4].mxu0 }
 0x54f   :  { %v3160_v9 = vadd.f32 %v1673_v13, %v1078_v5  ;;  %v1675_v42 = vpop.f32.mrb[5].mxu0 }
 0x552   :  { %v1678_v8 = vpop.f32.mrb[6].mxu0 }
 0x553   :  { %v3162_v25 = vadd.f32 %v1678_v8, %v1083_v10  ;;  %v1680_v46 = vpop.f32.mrb[7].mxu0 }
 0x556   :  { %v1683_v47 = vpop.f32.mrb[8].mxu0 }
 0x557   :  { %v3164_v49 = vadd.f32 %v1683_v47, %v1088_v32  ;;  %v1685_v50 = vpop.f32.mrb[9].mxu0 }
 0x558   :  { %2551 = dma.done.wait [#allocation4], 1024 }
 0x559   :  { %2552 = vsyncadd [#allocation4], 4294966272  ;;  %v3339_v53 = vmov 0.0   ;;  %v2568_v58 = vmov 9   ;;  %vm1708_vm3 = vcmask 1040384   ;;  %vm2569_vm4 = vmmov 1  }
 0x55a   :  { %1785 = vmatprep.mubr.f32.mxu1 %v3339_v53  ;;  %2464 = vset.pattern.permute.xlu0 %v2568_v58  ;;  %vm3167_vm5 = vmpackc.low %vm1708_vm3, %vm2569_vm4  ;;  %v1693_v61 = vld [vmem:[#allocation2 + $0x8] sm:$0xff]  ;;  %v1692_v52 = vld [vmem:[#allocation2] sm:$0xff]  ;;  %vm1705_vm6 = vcmask 72704   ;;  %v1867_v20 = vlaneseq  ;;  %v2570_v35 = vmov 0.00390625   ;;  %vm2042_vm4 = vcmask 1043456   ;;  %s2572_s21 = smov 4  }
 0x55b   :  { %v1697_v0 = vld [vmem:[#allocation2 + $0x28] sm:$0x1]  ;;  %v1696_v3 = vld [vmem:[#allocation2 + $0x20] sm:$0x1]  ;;  %v1695_v6 = vld [vmem:[#allocation2 + $0x18] sm:$0xff] }
 0x55c   :  { %v2326_v1 = vpack.c.bf16 %v1697_v0, %v1693_v61  ;;  %v1691_v4 = vld [vmem:[%s3246_s3] sm:$0xf]  ;;  %v2329_v7 = vpack.c.bf16 %v1696_v3, %v1692_v52  ;;  %v1699_v12 = vld [vmem:[#allocation2 + $0x38] sm:$0x1]  ;;  %v1694_v14 = vld [vmem:[#allocation2 + $0x10] sm:$0xff]  ;;  %v3183_v21 = vshrl.u32 %v1867_v20, 7 }
 0x55d   :  { %v1698_v15 = vld [vmem:[#allocation2 + $0x30] sm:$0x1]  ;;  %1702 = vperm.xlu0 %2464, %v1691_v4   ;;  %v2332_v18 = vpack.c.bf16 %v1699_v12, %v1695_v6  ;;  %v1868_v24 = vand.u32 127, %v1867_v20  ;;  %v2032_v48 = vld [vmem:[%s3246_s3 + $0x8] sm:$0xf]  ;;  %v2121_v54 = vld [vmem:[%s3246_s3 + $0x18] sm:$0xff] }
 0x55e   :  { %2328 = vmatprep.subr.msk.bf16.mxu1 %vm3167_vm5, %v2326_v1  ;;  %v2335_v19 = vpack.c.bf16 %v1698_v15, %v1694_v14  ;;  %v1874_v29 = vmul.u32 256, %v3183_v21  ;;  %v3348_v11 = vld [vmem:[#allocation21_spill] sm:$0xff]  ;;  %v3349_v5 = vld [vmem:[#allocation22_spill] sm:$0xff]  ;;  %v2268_v39 = vld [vmem:[%s3246_s3 + $0x10] ss:$0 sm:$0xff]  ;;  %v2199_v44 = vsub.s32 0, %v3183_v21 }
 0x55f   :  { %2331 = vmatpush1.bf16.msk.msra.mxu1 %vm3167_vm5, %v2329_v7  ;;  %v1869_v33 = vadd.s32 128, %v1868_v24  ;;  %v1871_v38 = vadd.s32 384, %v1868_v24  ;;  %v1870_v23 = vadd.s32 256, %v1868_v24  ;;  %v2203_v13 = vsub.s32 1, %v3183_v21 }
 0x560   :  { %2334 = vmatprep.subr.msk.bf16.mxu1 %vm3167_vm5, %v2332_v18  ;;  %v1879_v34 = vadd.s32 256, %v1874_v29  ;;  %vm1875_vm10 = vcmp.ge.s32.totalorder %v1868_v24, %v1874_v29 }
 0x561   :  { %vm1876_vm7 = vcmp.ge.s32.totalorder %v1869_v33, %v1874_v29  ;;  %vm1878_vm13 = vcmp.ge.s32.totalorder %v1871_v38, %v1874_v29  ;;  %vm1877_vm15 = vcmp.ge.s32.totalorder %v1870_v23, %v1874_v29 }
 0x562   :  { %2260 = vmatmul.mubr.msk.f32.vlgmr.msra.gmra.mrb[18].mxu1 %vm1705_vm6, %v1691_v4  ;;  %vm1881_vm8 = vcmp.lt.s32.totalorder %v1869_v33, %v1879_v34  ;;  %vm1880_vm11 = vcmp.lt.s32.totalorder %v1868_v24, %v1879_v34  ;;  %vm1883_vm14 = vcmp.lt.s32.totalorder %v1871_v38, %v1879_v34  ;;  %vm1882_vm1 = vcmp.lt.s32.totalorder %v1870_v23, %v1879_v34 }
 0x563   :  { %2337 = vmatpush1.bf16.msk.msra.mxu1 %vm3167_vm5, %v2335_v19  ;;  %1856 = vmatprep.mubr.f32.mxu1 %v3339_v53  ;;  %vm1885_vm9 = vmand %vm1876_vm7, %vm1881_vm8  ;;  %vm2571_vm5 = vmmov 0  }
 0x564   :  { %vm3186_vm12 = vmand %vm1875_vm10, %vm1880_vm11 }
 0x565   :  { %vm3190_vm2 = vmand %vm1878_vm13, %vm1883_vm14 }
 0x566   :  { %2263 = vmatmul.mubr.msk.f32.vlgmr.msra.gmra.mrb[20].mxu1 %vm1705_vm6, %v1691_v4  ;;  %vm3194_vm3 = vmand %vm1877_vm15, %vm1882_vm1  ;;  %vm2038_vm6 = vcmask 31744  }
 0x567   :  { %2264 = vmatprep.mubr.msk.f32.mxu1 %vm1885_vm9, %v2570_v35 }
 0x5dc   :  { %v1703_v27 = vpop.permute.xlu0 %1702 }
 0x635   :  { %v1787_v30 = vpop.f32.mrb[18].mxu1 }
 0x636   :  { %v1788_v26 = vadd.f32 %v1787_v30, %v1703_v27  ;;  %v1789_v62 = vpop.f32.mrb[19].mxu1 }
 0x637   :  { %v1790_v40 = vadd.f32 %v1789_v62, %v1703_v27 }
 0x638   :  { %v1863_v57 = vmax.f32 %v1788_v26, 0.0 }
 0x639   :  { %v1864_v45 = vmax.f32 %v1790_v40, 0.0  ;;  %v1858_v51 = vpop.f32.mrb[20].mxu1 }
 0x63a   :  { %v1859_v63 = vadd.f32 %v1858_v51, %v1703_v27  ;;  %v1860_v55 = vpop.f32.mrb[21].mxu1 }
 0x63b   :  { %v1861_v2 = vadd.f32 %v1860_v55, %v1703_v27  ;;  %1892 = vmatprep.subr.mxu1 %v1864_v45 }
 0x63c   :  { %1893 = vmatpush1.xpose.msra.mxu1 %v1863_v57  ;;  %v1865_v16 = vmax.f32 %v1859_v63, 0.0 }
 0x63d   :  { %v1866_v17 = vmax.f32 %v1861_v2, 0.0 }
 0x63f   :  { %2265 = vmatmul.mubr.msk.f32.vlgmr.msra.gmra.mrb[22].mxu1 %vm3186_vm12, %v2570_v35  ;;  %1962 = vmatprep.subr.mxu1 %v1866_v17 }
 0x640   :  { %1963 = vmatpush1.xpose.msra.mxu1 %v1865_v16  ;;  %2266 = vmatprep.mubr.msk.f32.mxu1 %vm3190_vm2, %v2570_v35 }
 0x641   :  { %2302 = vmatprep.subr.mxu1 %v3339_v53 }
 0x647   :  { %2267 = vmatmul.mubr.msk.f32.vlgmr.msra.gmra.mrb[22].mxu1 %vm3194_vm3, %v2570_v35 }
 0x648   :  { %2303 = vmatpush3.msk.msra.mxu1 %vm2042_vm4, %v2032_v48  ;;  %2304 = vmatprep.mubr.msk.f32.mxu1 %vm2571_vm5, %v3339_v53 }
 0x649   :  { %2307 = vmatprep.subr.mxu1 %v2121_v54 }
 0x71a   :  { %v2028_v56 = vpop.f32.mrb[22].mxu1 }
 0x71b   :  { %v2030_v60 = vpop.f32.mrb[23].mxu1  ;;  %2305 = vmatmul.mubr.msk.f32.vlgmr.msra.gmra.mrb[24].mxu1 %vm2038_vm6, %v2028_v56 }
 0x71c   :  { %2308 = vmatpush3.msra.mxu1 %v2121_v54  ;;  %2309 = vmatprep.mubr.msk.f32.mxu1 %vm133_vm0, %v3348_v11 }
 0x71f   :  { %2310 = vmatmul.mubr.msk.f32.vlgmr.msra.gmra.mrb[26].mxu1 %vm133_vm0, %v3349_v5 }
 0x7ee   :  { %v2112_v10 = vpop.f32.mrb[24].mxu1 }
 0x7ef   :  { %v2113_v22 = vadd.f32 %v2268_v39, %v2112_v10  ;;  %v2306_v32 = vpop.f32.mrb[25].mxu1 }
 0x7f1   :  { %2117 = vrot.lane.b32.xlu0 %v2113_v22, %s2572_s21 }
 0x7f2   :  { %v2311_v37 = vpop.f32.mrb[26].mxu1 }
 0x7f3   :  { %v2188_v41 = vpop.f32.mrb[27].mxu1 }
 0x863   :  { %v2118_v42 = vpop.permute.xlu0 %2117 }
 0x864   :  { %v2120_v8 = vsel %vm2038_vm6, %v2113_v22, %v2118_v42 }
 0x865   :  { %v2200_v46 = vrot.slane %v2120_v8, %v2199_v44  ;;  %v2204_v47 = vrot.slane %v2120_v8, %v2203_v13 }
 0x867   :  { %v2206_v50 = vmul.f32 %v3160_v9, %v2200_v46  ;;  %v2208_v53 = vmul.f32 %v3164_v49, %v2204_v47  ;;  %v2205_v58 = vmul.f32 %v3158_v43, %v2200_v46  ;;  %v2207_v59 = vmul.f32 %v3162_v25, %v2204_v47 }
 0x869   :  { %v2210_v61 = vadd.f32 %v2311_v37, %v2206_v50  ;;  %v2212_v0 = vadd.f32 %v2311_v37, %v2208_v53  ;;  %v2209_v52 = vadd.f32 %v2205_v58, %v2188_v41  ;;  %v2211_v1 = vadd.f32 %v2207_v59, %v2188_v41 }
 0x86b   :  { %2214 = vst.msk [vmem:[%s3250_s7 + $0x8] sm:$0xff] %vm133_vm0, %v2210_v61  ;;  %2216 = vst.msk [vmem:[%s3250_s7 + $0x18] sm:$0xff] %vm133_vm0, %v2212_v0 }
 0x86c   :  { %2213 = vst.msk [vmem:[%s3250_s7] sm:$0xff] %vm133_vm0, %v2209_v52  ;;  %2215 = vst.msk [vmem:[%s3250_s7 + $0x10] sm:$0xff] %vm133_vm0, %v2211_v1 }
 0x86d   :  { %2221 = vsyncpa [#allocation6], 1 }
 0x86e   :  { %2222 = vsyncpa [#allocation9], 1 }
 0x86f   :  { %2223 = vsyncpa [#allocation7], 1 }
 0x870   :  { %2224 = vsyncmov [#allocation4] }
 0x873   :  { %s2225_s1 = vpop.sfrf %2224 }
 0x874   :  { %p2273_p1 = scmp.ne.s32.totalorder %s2225_s1, 0 }
 0x876   :  { %2229 = shalt.err (%p2273_p1)  }
 0x877   :  { %2231 = vsyncmov [#allocation4 + $0x1] }
 0x87a   :  { %s2232_s4 = vpop.sfrf %2231 }
 0x87b   :  { %p2274_p2 = scmp.ne.s32.totalorder %s2232_s4, 0 }
 0x87d   :  { %2236 = shalt.err (%p2274_p2)  }

</bundles_post_ra>
